<compile_context>
chip_gen: v6e
topology: v6e:2x2x1
jax: 0.10.0
libtpu: 0.0.40
codegen_flags: <defaults>
</compile_context>

<pallas_src>
import jax
import jax.numpy as jnp
from jax import lax
from jax.experimental import pallas as pl
from jax.experimental.pallas import tpu as pltpu


# ----------------------------- Pallas kernel --------------------------------

def _make_mlp_dynamics_kernel(n_hidden: int, simplex_dim: int,
                              ln_eps: float = 1e-5,
                              matmul_dtype=jnp.float32):
    """Build a kernel closure for a fixed (static) layer structure.

    Ref order (all weights already block-diagonalized / tiled for row packing):
      x, a,
      Wz, Wa, bgb_1, Gmean_1,
      [W_i, bgb_i, Gmean_i] * (n_hidden - 1),
      W_out, b_out, Gsim,
      o
    where bgb_i = stacked (bias, gamma, beta) of shape (3, P*H_i),
          Gmean_i = block-diag (P*H_i, P*H_i) matrix with 1/H_i in same-LN-group entries,
          Gsim    = block-diag (P*out, P*out) matrix of ones over SimNorm groups.
    """
    inv_sd = 1.0 / float(simplex_dim)

    def _mish(h):
        # x * tanh(softplus(x)) == x * (s^2 - 1) / (s^2 + 1), s = 1 + exp(x).
        # One EUP exp instead of exp + log + tanh. The divide is kept exact so the
        # f32 correctness check stays tight (pl.reciprocal(approx=True) is available
        # here too, but EUP is no longer the binding slot after row packing).
        e = jnp.exp(jnp.minimum(h, 20.0))
        s = 1.0 + e
        s2 = s * s
        t = (s2 - 1.0) / (s2 + 1.0)
        return h * jnp.where(h > 20.0, 1.0, t)           # tanh(softplus(x)) -> 1 for large x

    def _ln_mish(y, bgb_ref, gmean_ref):
        # Two-pass LayerNorm per original row (packed as a lane group), statistics via
        # block-diagonal mean matmuls on the otherwise-idle MXU. More stable than
        # E[x^2] - E[x]^2 and costs nothing on the critical (VPU/EUP) path.
        g = gmean_ref[...]
        mu = jnp.dot(y, g, preferred_element_type=jnp.float32)       # group mean, broadcast
        d = y - mu
        var = jnp.dot(d * d, g, preferred_element_type=jnp.float32)  # group var, broadcast
        h = d * lax.rsqrt(var + ln_eps) * bgb_ref[1:2, :] + bgb_ref[2:3, :]
        return _mish(h)

    def kernel(x_ref, a_ref, *rest):
        o_ref = rest[-1]
        p = rest[:-1]

        # ---- First hidden layer: concat fused as x@Wz + a@Wa (weights pre-cast) ----
        wz, wa, bgb, gm = p[0], p[1], p[2], p[3]
        y = (jnp.dot(x_ref[...].astype(matmul_dtype), wz[...],
                     preferred_element_type=jnp.float32)
             + jnp.dot(a_ref[...].astype(matmul_dtype), wa[...],
                       preferred_element_type=jnp.float32)
             + bgb[0:1, :])
        h = _ln_mish(y, bgb, gm)

        # ---- Remaining hidden layers: Linear -> LayerNorm -> Mish ----
        idx = 4
        for _ in range(n_hidden - 1):
            w, bgb, gm = p[idx], p[idx + 1], p[idx + 2]
            idx += 3
            y = jnp.dot(h.astype(matmul_dtype), w[...],
                        preferred_element_type=jnp.float32) + bgb[0:1, :]
            h = _ln_mish(y, bgb, gm)

        # ---- Output layer: Linear ----
        w_out, b_out, gs_ref = p[idx], p[idx + 1], p[idx + 2]
        z = jnp.dot(h.astype(matmul_dtype), w_out[...],
                    preferred_element_type=jnp.float32) + b_out[...]

        # ---- SimNorm: groupwise softmax, fully lane-dense ----
        # Subtract the PER-GROUP mean (a per-group constant => softmax unchanged), clamp
        # the exponent so exp never over/underflows to 0/inf (no 0/0 NaN possible), then
        # broadcast group sums back via the block-diagonal ones matmul.
        gs = gs_ref[...]
        mu_g = jnp.dot(z, gs, preferred_element_type=jnp.float32) * inv_sd
        e = jnp.exp(jnp.clip(z - mu_g, -80.0, 80.0))
        s = jnp.dot(e, gs, preferred_element_type=jnp.float32)
        o_ref[...] = (e * pl.reciprocal(s, approx=True)).astype(o_ref.dtype)

    return kernel


# ------------------------------- Wrapper -------------------------------------

def _device_defaults():
    """(rows packed per lane-row, #TensorCores per chip) by TPU generation."""
    try:
        kind = jax.devices()[0].device_kind.lower()
    except Exception:
        kind = ""
    if ("v2" in kind) or ("v3" in kind) or ("v4" in kind) or ("v5" in kind):
        return 4, 1            # 128-wide MXU tiles, single TC
    if "v6" in kind:
        return 8, 1            # 256-wide MXU, single TC
    return 8, 2                # v7x and newer: 256-wide MXU, 2 TCs/chip


def mlp_dynamics_forward(x, a, params, *, simplex_dim: int, latent_dim: int,
                         pack_rows=None, block_rows: int = 4096,
                         matmul_dtype=jnp.float32, ln_eps: float = 1e-5):
    """params = [(W, b, gamma, beta), ..., (W_out, b_out)] with W as (in, out)."""
    assert latent_dim % simplex_dim == 0, "SimNorm requires latent_dim % simplex_dim == 0"

    x = x.astype(jnp.float32)
    a = a.astype(jnp.float32)
    B, zdim = x.shape
    act_dim = a.shape[1]
    n_hidden = len(params) - 1
    hidden_dims = [p[0].shape[1] for p in params[:-1]]
    out_dim = params[-1][0].shape[1]
    assert out_dim == latent_dim

    p_target, cores = _device_defaults()
    if pack_rows is not None:
        P = max(1, int(pack_rows))
    else:
        # Keep packed widths <= 512 so block-diag weights stay tiny; P=1 falls back to
        # the unpacked kernel automatically (kron(I_1, W) == W).
        max_w = max([zdim, act_dim, out_dim] + hidden_dims)
        P = max(1, min(p_target, 512 // max_w))

    # ---- Pack P batch rows into the lane axis (pad batch to a multiple of P) ----
    B_pad = ((B + P - 1) // P) * P
    if B_pad != B:
        x = jnp.concatenate([x, jnp.zeros((B_pad - B, zdim), jnp.float32)], axis=0)
        a = jnp.concatenate([a, jnp.zeros((B_pad - B, act_dim), jnp.float32)], axis=0)
    R = B_pad // P
    xp = x.reshape(R, P * zdim)            # contiguous => free reshape
    ap = a.reshape(R, P * act_dim)

    # ---- Build all VMEM-resident constants once, in the wrapper ----
    eyeP = jnp.eye(P, dtype=jnp.float32)

    def bdiag(W):                           # block-diagonal weight: kron(I_P, W)
        return jnp.kron(eyeP, W.astype(jnp.float32)).astype(matmul_dtype)

    def pack_bgb(b, g, be):                 # (3, P*H) stacked bias / gamma / beta
        return jnp.stack([jnp.tile(b, P), jnp.tile(g, P), jnp.tile(be, P)],
                         axis=0).astype(jnp.float32)

    def mean_mat(H):                        # block-diag 1/H matrix for LN group means
        return jnp.kron(eyeP, jnp.full((H, H), 1.0 / H, dtype=jnp.float32))

    W1, b1, g1, be1 = params[0]
    Wz, Wa = W1[:zdim, :], W1[zdim:, :]     # concat fused into two dots
    flat = [bdiag(Wz), bdiag(Wa), pack_bgb(b1, g1, be1), mean_mat(hidden_dims[0])]
    for (W, b, g, be) in params[1:-1]:
        flat += [bdiag(W), pack_bgb(b, g, be), mean_mat(W.shape[1])]
    W_out, b_out = params[-1]
    n_groups = (P * out_dim) // simplex_dim
    gsim = jnp.kron(jnp.eye(n_groups, dtype=jnp.float32),
                    jnp.ones((simplex_dim, simplex_dim), dtype=jnp.float32))
    flat += [bdiag(W_out), jnp.tile(b_out, P).reshape(1, -1).astype(jnp.float32), gsim]

    # ---- Batch tiling over packed rows ----
    max_tile = max(1, block_rows // P)                  # ~block_rows original rows per step
    if cores >= 2 and R >= 16:
        # Guarantee >= 2 grid steps so the "parallel" axis shards across both TCs (v7x).
        split = ((-(-R // cores)) + 7) // 8 * 8
        if split < R:
            max_tile = min(max_tile, split)
    if R <= max_tile:
        tile_r = R                                       # single full block
    else:
        tile_r = max(8, (max_tile // 8) * 8)             # sublane-aligned tile
    grid = (pl.cdiv(R, tile_r),)

    def row_spec(width):
        return pl.BlockSpec((tile_r, width), lambda i: (i, 0))

    def const_spec(arr):
        # Constant block index => loaded once, stays VMEM-resident across all batch tiles.
        # TODO(synk): pipeline_mode=pl.Buffered(1) would drop the redundant second buffer
        # for these constant blocks; omitted to stay on the maximally-compatible lowering path.
        return pl.BlockSpec(arr.shape, lambda i: (0, 0))

    in_specs = [row_spec(P * zdim), row_spec(P * act_dim)] + [const_spec(t) for t in flat]
    out_specs = row_spec(P * out_dim)

    # ---- Chip-aware scoped-VMEM budget (double-buffered IO + resident constants) ----
    param_bytes = sum(int(t.size) * t.dtype.itemsize for t in flat)
    io_bytes = 4 * tile_r * P * (zdim + act_dim + out_dim)
    interm_bytes = 48 * tile_r * P * max([out_dim] + hidden_dims)
    vmem_limit = 2 * param_bytes + 2 * io_bytes + interm_bytes + (8 << 20)
    vmem_cap = (48 << 20) if cores >= 2 else (64 << 20)   # 64 MiB physical on v7x
    vmem_limit = int(min(max(vmem_limit, 32 << 20), vmem_cap))

    kernel = _make_mlp_dynamics_kernel(n_hidden, simplex_dim,
                                       ln_eps=ln_eps, matmul_dtype=matmul_dtype)

    o_packed = pl.pallas_call(
        kernel,
        out_shape=jax.ShapeDtypeStruct((R, P * out_dim), jnp.float32),
        grid=grid,
        in_specs=in_specs,
        out_specs=out_specs,
        compiler_params=pltpu.CompilerParams(
            dimension_semantics=("parallel",),   # megacore / 2-TC sharding on v7x
            vmem_limit_bytes=vmem_limit,
        ),
    )(xp, ap, *flat)

    # Un-pack: (R, P*out) -> (B_pad, out) is a contiguous (free) reshape.
    return o_packed.reshape(B_pad, out_dim)[:B]


# --------------------------- Parameter construction --------------------------

def _orthogonal(key, shape, gain=1.0, dtype=jnp.float32):
    """Deterministic orthogonal init (matches torch.nn.init.orthogonal_ semantics)."""
    rows, cols = shape
    n = max(rows, cols)
    amat = jax.random.normal(key, (n, n), dtype=jnp.float32)
    q, r = jnp.linalg.qr(amat)
    q = q * jnp.sign(jnp.diag(r))
    return (gain * q[:rows, :cols]).astype(dtype)


def init_mlp_dynamics_params(key, in_dim, mlp_dims, out_dim):
    """Returns [(W, b, gamma, beta) per hidden layer, (W_out, b_out)], W as (in, out)."""
    dims = [in_dim] + list(mlp_dims) + [out_dim]
    params = []
    for i in range(len(dims) - 2):
        key, sub = jax.random.split(key)
        W_t = _orthogonal(sub, (dims[i + 1], dims[i]))   # torch layout (out, in)
        params.append((
            W_t.T,                                        # (in, out)
            jnp.zeros((dims[i + 1],), jnp.float32),       # bias
            jnp.ones((dims[i + 1],), jnp.float32),        # LayerNorm gamma
            jnp.zeros((dims[i + 1],), jnp.float32),       # LayerNorm beta
        ))
    key, sub = jax.random.split(key)
    W_t = _orthogonal(sub, (dims[-1], dims[-2]))
    params.append((W_t.T, jnp.zeros((dims[-1],), jnp.float32)))
    return params


# ----------------------------- Pure-JAX reference ----------------------------

def _reference(x, a, params, simplex_dim, latent_dim):
    h = jnp.concatenate([x, a], axis=1)
    for (W, b, g, beta) in params[:-1]:
        h = h @ W + b
        mu = h.mean(-1, keepdims=True)
        var = ((h - mu) ** 2).mean(-1, keepdims=True)
        h = (h - mu) * lax.rsqrt(var + 1e-5) * g + beta
        h = h * jnp.tanh(jax.nn.softplus(h))              # Mish
    W, b = params[-1]
    z = h @ W + b
    z = z.reshape(z.shape[0], latent_dim // simplex_dim, simplex_dim)
    z = jax.nn.softmax(z, axis=-1)                        # SimNorm
    return z.reshape(z.shape[0], latent_dim)


# ------------------------------------ main ------------------------------------

if __name__ == "__main__":
    # Small shapes consistent with the module:
    #   action_space.shape = (4,)  -> action_dim = 4
    #   latent_dim = 20, simplex_dim = 10, mlp_dims = [32, 32], batch = 8
    batch = 8
    action_dim = 4
    latent_dim = 20
    simplex_dim = 10
    mlp_dims = [32, 32]
    in_dim = action_dim + latent_dim

    key = jax.random.PRNGKey(0)
    kx, ka, kp = jax.random.split(key, 3)
    x = jax.random.normal(kx, (batch, latent_dim), jnp.float32)
    a = jax.random.normal(ka, (batch, action_dim), jnp.float32)
    params = init_mlp_dynamics_params(kp, in_dim, mlp_dims, latent_dim)

    z = mlp_dynamics_forward(x, a, params,
                             simplex_dim=simplex_dim, latent_dim=latent_dim)
    z = jax.block_until_ready(z)

    z_ref = _reference(x, a, params, simplex_dim, latent_dim)
    assert z.shape == (batch, latent_dim)
    assert bool(jnp.all(jnp.isfinite(z))), "non-finite output"
    # Tolerance covers FP-level rewrites (matmul-based LN stats, exp-form Mish,
    # group-mean-shift softmax) plus the EUP approx reciprocal in SimNorm.
    assert jnp.allclose(z, z_ref, atol=2e-3, rtol=2e-3), "mismatch vs JAX reference"

    print("KERNEL_OK")
</pallas_src>

<mosaic_0001>
module attributes {stable_mosaic.version = 11 : i64} {
  func.func @kernel(%arg0: i32, %arg1: memref<1x160xf32, #tpu.memory_space<vmem>>, %arg2: memref<1x32xf32, #tpu.memory_space<vmem>>, %arg3: memref<160x256xf32, #tpu.memory_space<vmem>>, %arg4: memref<32x256xf32, #tpu.memory_space<vmem>>, %arg5: memref<3x256xf32, #tpu.memory_space<vmem>>, %arg6: memref<256x256xf32, #tpu.memory_space<vmem>>, %arg7: memref<256x256xf32, #tpu.memory_space<vmem>>, %arg8: memref<3x256xf32, #tpu.memory_space<vmem>>, %arg9: memref<256x256xf32, #tpu.memory_space<vmem>>, %arg10: memref<256x160xf32, #tpu.memory_space<vmem>>, %arg11: memref<1x160xf32, #tpu.memory_space<vmem>>, %arg12: memref<160x160xf32, #tpu.memory_space<vmem>>, %arg13: memref<1x160xf32, #tpu.memory_space<vmem>>) attributes {dimension_semantics = [#tpu.dimension_semantics<parallel>], iteration_bounds = array<i64: 1>, scalar_prefetch = 0 : i64, scratch_operands = 0 : i64, tpu.core_type = #tpu.core_type<tc>, window_params = [{transform_indices = @transform_0, window_bounds = array<i64: 1, 160>}, {transform_indices = @transform_1, window_bounds = array<i64: 1, 32>}, {pipeline_mode = #tpu.pipeline_mode<synchronous>, transform_indices = @transform_2, window_bounds = array<i64: 160, 256>}, {pipeline_mode = #tpu.pipeline_mode<synchronous>, transform_indices = @transform_3, window_bounds = array<i64: 32, 256>}, {pipeline_mode = #tpu.pipeline_mode<synchronous>, transform_indices = @transform_4, window_bounds = array<i64: 3, 256>}, {pipeline_mode = #tpu.pipeline_mode<synchronous>, transform_indices = @transform_5, window_bounds = array<i64: 256, 256>}, {pipeline_mode = #tpu.pipeline_mode<synchronous>, transform_indices = @transform_6, window_bounds = array<i64: 256, 256>}, {pipeline_mode = #tpu.pipeline_mode<synchronous>, transform_indices = @transform_7, window_bounds = array<i64: 3, 256>}, {pipeline_mode = #tpu.pipeline_mode<synchronous>, transform_indices = @transform_8, window_bounds = array<i64: 256, 256>}, {pipeline_mode = #tpu.pipeline_mode<synchronous>, transform_indices = @transform_9, window_bounds = array<i64: 256, 160>}, {pipeline_mode = #tpu.pipeline_mode<synchronous>, transform_indices = @transform_10, window_bounds = array<i64: 1, 160>}, {pipeline_mode = #tpu.pipeline_mode<synchronous>, transform_indices = @transform_11, window_bounds = array<i64: 160, 160>}, {transform_indices = @transform_12, window_bounds = array<i64: 1, 160>}]} {
    %c0 = arith.constant 0 : index
    %c0_0 = arith.constant 0 : index
    %0 = vector.load %arg1[%c0, %c0_0] : memref<1x160xf32, #tpu.memory_space<vmem>>, vector<1x160xf32>
    %c0_1 = arith.constant 0 : index
    %c0_2 = arith.constant 0 : index
    %1 = vector.load %arg3[%c0_1, %c0_2] : memref<160x256xf32, #tpu.memory_space<vmem>>, vector<160x256xf32>
    %cst = arith.constant dense<0.000000e+00> : vector<1x256xf32>
    %2 = tpu.matmul %0, %1, %cst {dimension_numbers = #tpu.dot_dimension_numbers<[1], [0], [0], [1], [0, 0, 1, 1], [], []>} : vector<1x160xf32>, vector<160x256xf32>, vector<1x256xf32> -> vector<1x256xf32>
    %c0_3 = arith.constant 0 : index
    %c0_4 = arith.constant 0 : index
    %3 = vector.load %arg2[%c0_3, %c0_4] : memref<1x32xf32, #tpu.memory_space<vmem>>, vector<1x32xf32>
    %c0_5 = arith.constant 0 : index
    %c0_6 = arith.constant 0 : index
    %4 = vector.load %arg4[%c0_5, %c0_6] : memref<32x256xf32, #tpu.memory_space<vmem>>, vector<32x256xf32>
    %cst_7 = arith.constant dense<0.000000e+00> : vector<1x256xf32>
    %5 = tpu.matmul %3, %4, %cst_7 {dimension_numbers = #tpu.dot_dimension_numbers<[1], [0], [0], [1], [0, 0, 1, 1], [], []>} : vector<1x32xf32>, vector<32x256xf32>, vector<1x256xf32> -> vector<1x256xf32>
    %6 = arith.addf %2, %5 : vector<1x256xf32>
    %c0_8 = arith.constant 0 : index
    %c0_9 = arith.constant 0 : index
    %7 = vector.load %arg5[%c0_8, %c0_9] : memref<3x256xf32, #tpu.memory_space<vmem>>, vector<1x256xf32>
    %8 = arith.addf %6, %7 : vector<1x256xf32>
    %c0_10 = arith.constant 0 : index
    %c0_11 = arith.constant 0 : index
    %9 = vector.load %arg6[%c0_10, %c0_11] : memref<256x256xf32, #tpu.memory_space<vmem>>, vector<256x256xf32>
    %cst_12 = arith.constant dense<0.000000e+00> : vector<1x256xf32>
    %10 = tpu.matmul %8, %9, %cst_12 {dimension_numbers = #tpu.dot_dimension_numbers<[1], [0], [0], [1], [0, 0, 1, 1], [], []>} : vector<1x256xf32>, vector<256x256xf32>, vector<1x256xf32> -> vector<1x256xf32>
    %11 = arith.subf %8, %10 : vector<1x256xf32>
    %12 = arith.mulf %11, %11 : vector<1x256xf32>
    %cst_13 = arith.constant dense<0.000000e+00> : vector<1x256xf32>
    %13 = tpu.matmul %12, %9, %cst_13 {dimension_numbers = #tpu.dot_dimension_numbers<[1], [0], [0], [1], [0, 0, 1, 1], [], []>} : vector<1x256xf32>, vector<256x256xf32>, vector<1x256xf32> -> vector<1x256xf32>
    %cst_14 = arith.constant 9.99999974E-6 : f32
    %14 = vector.broadcast %cst_14 : f32 to vector<1x256xf32>
    %15 = arith.addf %13, %14 : vector<1x256xf32>
    %16 = math.rsqrt %15 : vector<1x256xf32>
    %17 = arith.mulf %11, %16 : vector<1x256xf32>
    %c1 = arith.constant 1 : index
    %c0_15 = arith.constant 0 : index
    %18 = vector.load %arg5[%c1, %c0_15] : memref<3x256xf32, #tpu.memory_space<vmem>>, vector<1x256xf32>
    %19 = arith.mulf %17, %18 : vector<1x256xf32>
    %c2 = arith.constant 2 : index
    %c0_16 = arith.constant 0 : index
    %20 = vector.load %arg5[%c2, %c0_16] : memref<3x256xf32, #tpu.memory_space<vmem>>, vector<1x256xf32>
    %21 = arith.addf %19, %20 : vector<1x256xf32>
    %cst_17 = arith.constant 2.000000e+01 : f32
    %22 = vector.broadcast %cst_17 : f32 to vector<1x256xf32>
    %23 = arith.minimumf %21, %22 : vector<1x256xf32>
    %24 = math.exp %23 : vector<1x256xf32>
    %cst_18 = arith.constant 1.000000e+00 : f32
    %25 = vector.broadcast %cst_18 : f32 to vector<1x256xf32>
    %26 = arith.addf %25, %24 : vector<1x256xf32>
    %27 = arith.mulf %26, %26 : vector<1x256xf32>
    %cst_19 = arith.constant 1.000000e+00 : f32
    %28 = vector.broadcast %cst_19 : f32 to vector<1x256xf32>
    %29 = arith.subf %27, %28 : vector<1x256xf32>
    %cst_20 = arith.constant 1.000000e+00 : f32
    %30 = vector.broadcast %cst_20 : f32 to vector<1x256xf32>
    %31 = arith.addf %27, %30 : vector<1x256xf32>
    %32 = arith.divf %29, %31 : vector<1x256xf32>
    %cst_21 = arith.constant 2.000000e+01 : f32
    %33 = vector.broadcast %cst_21 : f32 to vector<1x256xf32>
    %34 = arith.cmpf ogt, %21, %33 : vector<1x256xf32>
    %cst_22 = arith.constant 1.000000e+00 : f32
    %35 = vector.broadcast %cst_22 : f32 to vector<1x256xf32>
    %36 = arith.select %34, %35, %32 : vector<1x256xi1>, vector<1x256xf32>
    %37 = arith.mulf %21, %36 : vector<1x256xf32>
    %c0_23 = arith.constant 0 : index
    %c0_24 = arith.constant 0 : index
    %38 = vector.load %arg7[%c0_23, %c0_24] : memref<256x256xf32, #tpu.memory_space<vmem>>, vector<256x256xf32>
    %cst_25 = arith.constant dense<0.000000e+00> : vector<1x256xf32>
    %39 = tpu.matmul %37, %38, %cst_25 {dimension_numbers = #tpu.dot_dimension_numbers<[1], [0], [0], [1], [0, 0, 1, 1], [], []>} : vector<1x256xf32>, vector<256x256xf32>, vector<1x256xf32> -> vector<1x256xf32>
    %c0_26 = arith.constant 0 : index
    %c0_27 = arith.constant 0 : index
    %40 = vector.load %arg8[%c0_26, %c0_27] : memref<3x256xf32, #tpu.memory_space<vmem>>, vector<1x256xf32>
    %41 = arith.addf %39, %40 : vector<1x256xf32>
    %c0_28 = arith.constant 0 : index
    %c0_29 = arith.constant 0 : index
    %42 = vector.load %arg9[%c0_28, %c0_29] : memref<256x256xf32, #tpu.memory_space<vmem>>, vector<256x256xf32>
    %cst_30 = arith.constant dense<0.000000e+00> : vector<1x256xf32>
    %43 = tpu.matmul %41, %42, %cst_30 {dimension_numbers = #tpu.dot_dimension_numbers<[1], [0], [0], [1], [0, 0, 1, 1], [], []>} : vector<1x256xf32>, vector<256x256xf32>, vector<1x256xf32> -> vector<1x256xf32>
    %44 = arith.subf %41, %43 : vector<1x256xf32>
    %45 = arith.mulf %44, %44 : vector<1x256xf32>
    %cst_31 = arith.constant dense<0.000000e+00> : vector<1x256xf32>
    %46 = tpu.matmul %45, %42, %cst_31 {dimension_numbers = #tpu.dot_dimension_numbers<[1], [0], [0], [1], [0, 0, 1, 1], [], []>} : vector<1x256xf32>, vector<256x256xf32>, vector<1x256xf32> -> vector<1x256xf32>
    %cst_32 = arith.constant 9.99999974E-6 : f32
    %47 = vector.broadcast %cst_32 : f32 to vector<1x256xf32>
    %48 = arith.addf %46, %47 : vector<1x256xf32>
    %49 = math.rsqrt %48 : vector<1x256xf32>
    %50 = arith.mulf %44, %49 : vector<1x256xf32>
    %c1_33 = arith.constant 1 : index
    %c0_34 = arith.constant 0 : index
    %51 = vector.load %arg8[%c1_33, %c0_34] : memref<3x256xf32, #tpu.memory_space<vmem>>, vector<1x256xf32>
    %52 = arith.mulf %50, %51 : vector<1x256xf32>
    %c2_35 = arith.constant 2 : index
    %c0_36 = arith.constant 0 : index
    %53 = vector.load %arg8[%c2_35, %c0_36] : memref<3x256xf32, #tpu.memory_space<vmem>>, vector<1x256xf32>
    %54 = arith.addf %52, %53 : vector<1x256xf32>
    %cst_37 = arith.constant 2.000000e+01 : f32
    %55 = vector.broadcast %cst_37 : f32 to vector<1x256xf32>
    %56 = arith.minimumf %54, %55 : vector<1x256xf32>
    %57 = math.exp %56 : vector<1x256xf32>
    %cst_38 = arith.constant 1.000000e+00 : f32
    %58 = vector.broadcast %cst_38 : f32 to vector<1x256xf32>
    %59 = arith.addf %58, %57 : vector<1x256xf32>
    %60 = arith.mulf %59, %59 : vector<1x256xf32>
    %cst_39 = arith.constant 1.000000e+00 : f32
    %61 = vector.broadcast %cst_39 : f32 to vector<1x256xf32>
    %62 = arith.subf %60, %61 : vector<1x256xf32>
    %cst_40 = arith.constant 1.000000e+00 : f32
    %63 = vector.broadcast %cst_40 : f32 to vector<1x256xf32>
    %64 = arith.addf %60, %63 : vector<1x256xf32>
    %65 = arith.divf %62, %64 : vector<1x256xf32>
    %cst_41 = arith.constant 2.000000e+01 : f32
    %66 = vector.broadcast %cst_41 : f32 to vector<1x256xf32>
    %67 = arith.cmpf ogt, %54, %66 : vector<1x256xf32>
    %cst_42 = arith.constant 1.000000e+00 : f32
    %68 = vector.broadcast %cst_42 : f32 to vector<1x256xf32>
    %69 = arith.select %67, %68, %65 : vector<1x256xi1>, vector<1x256xf32>
    %70 = arith.mulf %54, %69 : vector<1x256xf32>
    %c0_43 = arith.constant 0 : index
    %c0_44 = arith.constant 0 : index
    %71 = vector.load %arg10[%c0_43, %c0_44] : memref<256x160xf32, #tpu.memory_space<vmem>>, vector<256x160xf32>
    %cst_45 = arith.constant dense<0.000000e+00> : vector<1x160xf32>
    %72 = tpu.matmul %70, %71, %cst_45 {dimension_numbers = #tpu.dot_dimension_numbers<[1], [0], [0], [1], [0, 0, 1, 1], [], []>} : vector<1x256xf32>, vector<256x160xf32>, vector<1x160xf32> -> vector<1x160xf32>
    %c0_46 = arith.constant 0 : index
    %c0_47 = arith.constant 0 : index
    %73 = vector.load %arg11[%c0_46, %c0_47] : memref<1x160xf32, #tpu.memory_space<vmem>>, vector<1x160xf32>
    %74 = arith.addf %72, %73 : vector<1x160xf32>
    %c0_48 = arith.constant 0 : index
    %c0_49 = arith.constant 0 : index
    %75 = vector.load %arg12[%c0_48, %c0_49] : memref<160x160xf32, #tpu.memory_space<vmem>>, vector<160x160xf32>
    %cst_50 = arith.constant dense<0.000000e+00> : vector<1x160xf32>
    %76 = tpu.matmul %74, %75, %cst_50 {dimension_numbers = #tpu.dot_dimension_numbers<[1], [0], [0], [1], [0, 0, 1, 1], [], []>} : vector<1x160xf32>, vector<160x160xf32>, vector<1x160xf32> -> vector<1x160xf32>
    %cst_51 = arith.constant 1.000000e-01 : f32
    %77 = vector.broadcast %cst_51 : f32 to vector<1x160xf32>
    %78 = arith.mulf %76, %77 : vector<1x160xf32>
    %79 = arith.subf %74, %78 : vector<1x160xf32>
    %cst_52 = arith.constant -8.000000e+01 : f32
    %cst_53 = arith.constant 8.000000e+01 : f32
    %80 = vector.broadcast %cst_52 : f32 to vector<1x160xf32>
    %81 = arith.maximumf %80, %79 : vector<1x160xf32>
    %82 = vector.broadcast %cst_53 : f32 to vector<1x160xf32>
    %83 = arith.minimumf %82, %81 : vector<1x160xf32>
    %84 = math.exp %83 : vector<1x160xf32>
    %cst_54 = arith.constant dense<0.000000e+00> : vector<1x160xf32>
    %85 = tpu.matmul %84, %75, %cst_54 {dimension_numbers = #tpu.dot_dimension_numbers<[1], [0], [0], [1], [0, 0, 1, 1], [], []>} : vector<1x160xf32>, vector<160x160xf32>, vector<1x160xf32> -> vector<1x160xf32>
    %86 = tpu.reciprocal %85 {approx = true} : vector<1x160xf32> -> vector<1x160xf32>
    %87 = arith.mulf %84, %86 : vector<1x160xf32>
    %c0_55 = arith.constant 0 : index
    %c0_56 = arith.constant 0 : index
    %88 = vector.load %arg13[%c0_55, %c0_56] : memref<1x160xf32, #tpu.memory_space<vmem>>, vector<1x160xf32>
    tpu.vector_store %arg13[%c0_55, %c0_56], %87 {strides = array<i32>} : memref<1x160xf32, #tpu.memory_space<vmem>>, vector<1x160xf32>,
    return
  }
  func.func @transform_0(%arg0: i32) -> (i32, i32) {
    %c0_i32 = arith.constant 0 : i32
    %c0_i32_0 = arith.constant 0 : i32
    return %arg0, %c0_i32 : i32, i32
  }
  func.func @transform_1(%arg0: i32) -> (i32, i32) {
    %c0_i32 = arith.constant 0 : i32
    %c0_i32_0 = arith.constant 0 : i32
    return %arg0, %c0_i32 : i32, i32
  }
  func.func @transform_2(%arg0: i32) -> (i32, i32) {
    %c0_i32 = arith.constant 0 : i32
    %c0_i32_0 = arith.constant 0 : i32
    %c0_i32_1 = arith.constant 0 : i32
    return %c0_i32, %c0_i32_0 : i32, i32
  }
  func.func @transform_3(%arg0: i32) -> (i32, i32) {
    %c0_i32 = arith.constant 0 : i32
    %c0_i32_0 = arith.constant 0 : i32
    %c0_i32_1 = arith.constant 0 : i32
    return %c0_i32, %c0_i32_0 : i32, i32
  }
  func.func @transform_4(%arg0: i32) -> (i32, i32) {
    %c0_i32 = arith.constant 0 : i32
    %c0_i32_0 = arith.constant 0 : i32
    %c0_i32_1 = arith.constant 0 : i32
    return %c0_i32, %c0_i32_0 : i32, i32
  }
  func.func @transform_5(%arg0: i32) -> (i32, i32) {
    %c0_i32 = arith.constant 0 : i32
    %c0_i32_0 = arith.constant 0 : i32
    %c0_i32_1 = arith.constant 0 : i32
    return %c0_i32, %c0_i32_0 : i32, i32
  }
  func.func @transform_6(%arg0: i32) -> (i32, i32) {
    %c0_i32 = arith.constant 0 : i32
    %c0_i32_0 = arith.constant 0 : i32
    %c0_i32_1 = arith.constant 0 : i32
    return %c0_i32, %c0_i32_0 : i32, i32
  }
  func.func @transform_7(%arg0: i32) -> (i32, i32) {
    %c0_i32 = arith.constant 0 : i32
    %c0_i32_0 = arith.constant 0 : i32
    %c0_i32_1 = arith.constant 0 : i32
    return %c0_i32, %c0_i32_0 : i32, i32
  }
  func.func @transform_8(%arg0: i32) -> (i32, i32) {
    %c0_i32 = arith.constant 0 : i32
    %c0_i32_0 = arith.constant 0 : i32
    %c0_i32_1 = arith.constant 0 : i32
    return %c0_i32, %c0_i32_0 : i32, i32
  }
  func.func @transform_9(%arg0: i32) -> (i32, i32) {
    %c0_i32 = arith.constant 0 : i32
    %c0_i32_0 = arith.constant 0 : i32
    %c0_i32_1 = arith.constant 0 : i32
    return %c0_i32, %c0_i32_0 : i32, i32
  }
  func.func @transform_10(%arg0: i32) -> (i32, i32) {
    %c0_i32 = arith.constant 0 : i32
    %c0_i32_0 = arith.constant 0 : i32
    %c0_i32_1 = arith.constant 0 : i32
    return %c0_i32, %c0_i32_0 : i32, i32
  }
  func.func @transform_11(%arg0: i32) -> (i32, i32) {
    %c0_i32 = arith.constant 0 : i32
    %c0_i32_0 = arith.constant 0 : i32
    %c0_i32_1 = arith.constant 0 : i32
    return %c0_i32, %c0_i32_0 : i32, i32
  }
  func.func @transform_12(%arg0: i32) -> (i32, i32) {
    %c0_i32 = arith.constant 0 : i32
    %c0_i32_0 = arith.constant 0 : i32
    return %arg0, %c0_i32 : i32, i32
  }
}

</mosaic_0001>

<bundles_post_ra>
// kernel: tpu_custom_call.1
= control target key start
LH: loop header
LB: loop body
LE: loop exit
PB: predicated region body
PF: predicated region fallthrough
CT: control target
= control target key end

     0   :  { %17 = vsyncpa [#allocation3], 0  ;;  %s2809_s0 = inlined_call_operand.hbm [shape: f32[1,160], index: 0, kind: input, shape index: {}]   ;;  %s2810_s1 = inlined_call_operand.vmem [shape: f32[1,32], index: 1, kind: input, shape index: {}]   ;;  %s2811_s2 = inlined_call_operand.vmem [shape: f32[160,256], index: 2, kind: input, shape index: {}]   ;;  %s2812_s3 = inlined_call_operand.hbm [shape: f32[32,256], index: 3, kind: input, shape index: {}]   ;;  %s2813_s4 = inlined_call_operand.vmem [shape: f32[3,256], index: 4, kind: input, shape index: {}]   ;;  %s2814_s5 = inlined_call_operand.vmem [shape: f32[256,256], index: 5, kind: input, shape index: {}]   ;;  %s2815_s6 = inlined_call_operand.hbm [shape: f32[256,256], index: 6, kind: input, shape index: {}]   ;;  %s2816_s7 = inlined_call_operand.hbm [shape: f32[3,256], index: 7, kind: input, shape index: {}]   ;;  %s2817_s8 = inlined_call_operand.hbm [shape: f32[256,256], index: 8, kind: input, shape index: {}]   ;;  %s2818_s9 = inlined_call_operand.vmem [shape: f32[256,160], index: 9, kind: input, shape index: {}]   ;;  %s2819_s10 = inlined_call_operand.vmem [shape: f32[1,160], index: 10, kind: input, shape index: {}]   ;;  %s2820_s11 = inlined_call_operand.hbm [shape: f32[160,160], index: 11, kind: input, shape index: {}]   ;;  %s2821_s12 = inlined_call_operand.hbm [shape: f32[1,160], index: 12, kind: output, shape index: {}]  }
   0x1   :  { %18 = vsyncpa [#allocation6], 0 }
   0x2   :  { %19 = vsyncpa [#allocation9], 0 }
   0x3   :  { %20 = vsyncpa [#allocation12], 0 }
   0x4   :  { %21 = vsyncpa [#allocation4], 0  ;;  %s1622_s21 = smov [#allocation5]  }
   0x5   :  { %s41_s22 = sshll.u32 %s1622_s21, 4  ;;  %s42_s22 = int_to_ptr.vmem [resolvable:$true] %s41_s22 }
   0x6   :  { %s1480_s23 = scalar_lea.vmem %s42_s22, 1024  ;;  %p1485_p1 = scmp.lt.s32.totalorder %s42_s22, %s42_s22 }
   0x7   :  { %p1481_p0 = scmp.ne.s32.totalorder %s42_s22, %s1480_s23  ;;  %p1486_p2 = scmp.lt.s32.totalorder %s1480_s23, %s1480_s23 }
   0x9   :  { %p1487_p3 = por %p1486_p2, %p1485_p1 }
   0xb   :  { %p1488_p4 = pnand %p1487_p3, %p1481_p0 }
   0xd   :  { %1491 = shalt.err (!%p1488_p4)
}
   0xe   :  { %s1623_s24 = smov 256   ;;  %s1624_s25 = smov 16  }
   0xf   :  { %47 = dma.hbm_to_vmem [thread:$0]  %s2812_s3, 1024, %s42_s22, [#allocation6], %s1623_s24, %s1623_s24, %s1624_s25  }
  0x10   :  { %s1625_s28 = smov [#allocation8]   ;;  %s1626_s30 = smov [#allocation2]  }
  0x11   :  { %s70_s29 = sshll.u32 %s1625_s28, 4  ;;  %s28_s13 = sshll.u32 %s1626_s30, 4  ;;  %s71_s29 = int_to_ptr.vmem [resolvable:$true] %s70_s29  ;;  %s29_s13 = int_to_ptr.vmem [resolvable:$true] %s28_s13 }
  0x12   :  { %s1500_s14 = scalar_lea.vmem %s71_s29, 128  ;;  %p1505_p6 = scmp.lt.s32.totalorder %s71_s29, %s71_s29 }
  0x13   :  { %p1501_p5 = scmp.ne.s32.totalorder %s71_s29, %s1500_s14  ;;  %p1506_p7 = scmp.lt.s32.totalorder %s1500_s14, %s1500_s14 }
  0x15   :  { %p1507_p8 = por %p1506_p7, %p1505_p6 }
  0x17   :  { %p1508_p9 = pnand %p1507_p8, %p1501_p5 }
  0x19   :  { %1511 = shalt.err (!%p1508_p9)
}
  0x1a   :  { %73 = dma.hbm_to_vmem [thread:$0]  %s2816_s7, 128, %s71_s29, [#allocation9]  }
  0x1b   :  { %s1520_s17 = scalar_lea.vmem %s29_s13, 32  ;;  %p1525_p11 = scmp.lt.s32.totalorder %s29_s13, %s29_s13 }
  0x1c   :  { %p1521_p10 = scmp.ne.s32.totalorder %s29_s13, %s1520_s17  ;;  %p1526_p12 = scmp.lt.s32.totalorder %s1520_s17, %s1520_s17 }
  0x1e   :  { %p1527_p13 = por %p1526_p12, %p1525_p11 }
  0x20   :  { %p1528_p0 = pnand %p1527_p13, %p1521_p10 }
  0x22   :  { %1531 = shalt.err (!%p1528_p0)
}
  0x23   :  { %31 = dma.hbm_to_vmem [thread:$0]  %s2809_s0, 32, %s29_s13, [#allocation3]  }
  0x24   :  { %s1627_s19 = smov [#allocation7]   ;;  %s1628_s21 = smov [#allocation10]  }
  0x25   :  { %s57_s20 = sshll.u32 %s1627_s19, 4  ;;  %s79_s22 = sshll.u32 %s1628_s21, 4  ;;  %s58_s20 = int_to_ptr.vmem [resolvable:$true] %s57_s20  ;;  %s80_s22 = int_to_ptr.vmem [resolvable:$true] %s79_s22 }
  0x26   :  { %s1540_s23 = scalar_lea.vmem %s58_s20, 8192  ;;  %p1545_p2 = scmp.lt.s32.totalorder %s58_s20, %s58_s20 }
  0x27   :  { %p1541_p1 = scmp.ne.s32.totalorder %s58_s20, %s1540_s23  ;;  %p1546_p3 = scmp.lt.s32.totalorder %s1540_s23, %s1540_s23 }
  0x29   :  { %p1547_p4 = por %p1546_p3, %p1545_p2 }
  0x2b   :  { %p1548_p5 = pnand %p1547_p4, %p1541_p1 }
  0x2d   :  { %1551 = shalt.err (!%p1548_p5)
}
  0x2e   :  { %63 = dma.hbm_to_vmem [thread:$0]  %s2815_s6, 8192, %s58_s20, [#allocation6], %s1623_s24, %s1623_s24, %s1624_s25  }
  0x2f   :  { %s1560_s0 = scalar_lea.vmem %s80_s22, 8192  ;;  %p1565_p7 = scmp.lt.s32.totalorder %s80_s22, %s80_s22 }
  0x30   :  { %p1561_p6 = scmp.ne.s32.totalorder %s80_s22, %s1560_s0  ;;  %p1566_p8 = scmp.lt.s32.totalorder %s1560_s0, %s1560_s0 }
  0x32   :  { %p1567_p9 = por %p1566_p8, %p1565_p7 }
  0x34   :  { %p1568_p10 = pnand %p1567_p9, %p1561_p6 }
  0x36   :  { %1571 = shalt.err (!%p1568_p10)
}
  0x37   :  { %85 = dma.hbm_to_vmem [thread:$0]  %s2817_s8, 8192, %s80_s22, [#allocation9], %s1623_s24, %s1623_s24, %s1624_s25  }
  0x38   :  { %s1629_s29 = smov [#allocation11]  }
  0x39   :  { %s95_s30 = sshll.u32 %s1629_s29, 4  ;;  %s96_s30 = int_to_ptr.vmem [resolvable:$true] %s95_s30 }
  0x3a   :  { %s1580_s13 = scalar_lea.vmem %s96_s30, 5120  ;;  %p1585_p12 = scmp.lt.s32.totalorder %s96_s30, %s96_s30 }
  0x3b   :  { %p1581_p11 = scmp.ne.s32.totalorder %s96_s30, %s1580_s13  ;;  %p1586_p13 = scmp.lt.s32.totalorder %s1580_s13, %s1580_s13 }
  0x3d   :  { %p1587_p0 = por %p1586_p13, %p1585_p12 }
  0x3f   :  { %p1588_p1 = pnand %p1587_p0, %p1581_p11 }
  0x41   :  { %1591 = shalt.err (!%p1588_p1)
}
  0x42   :  { %101 = dma.hbm_to_vmem [thread:$0]  %s2820_s11, 5120, %s96_s30, [#allocation12], %s1623_s24, %s1623_s24, %s1624_s25  }
  0x43   :  { %1612 = dma.done.wait [#allocation3], 32  }
  0x44   :  { %1613 = vsyncadd [#allocation3], 4294967264 }
  0x45   :  { %1614 = dma.done.wait [#allocation6], 9216  }
  0x46   :  { %1615 = vsyncadd [#allocation6], 4294958080 }
  0x47   :  { %1616 = dma.done.wait [#allocation9], 8320  }
  0x48   :  { %1617 = vsyncadd [#allocation9], 4294958976 }
  0x49   :  { %1618 = dma.done.wait [#allocation12], 5120  }
  0x4a   :  { %1619 = vsyncadd [#allocation12], 4294962176  ;;  %v1630_v0 = vmov 0.0   ;;  %v152_v1 = vld [vmem:[%s2811_s2 + $0xf8] sm:$0xff]  ;;  %v151_v2 = vld [vmem:[%s2811_s2 + $0xf0] sm:$0xff]  ;;  %v2822_v9 = vlaneseq  ;;  %vm170_vm0 = vcmask 261120  }
  0x4b   :  { %238 = vmatprep.mubr.f32.mxu0 %v1630_v0  ;;  %v150_v3 = vld [vmem:[%s2811_s2 + $0xe8] sm:$0xff]  ;;  %257 = vmatprep.subr.mxu1 %v152_v1  ;;  %v149_v4 = vld [vmem:[%s2811_s2 + $0xe0] sm:$0xff]  ;;  %v148_v5 = vld [vmem:[%s2811_s2 + $0xd8] sm:$0xff] }
  0x4c   :  { %258 = vmatpush1.msra.mxu1 %v151_v2  ;;  %v147_v6 = vld [vmem:[%s2811_s2 + $0xd0] sm:$0xff]  ;;  %v146_v7 = vld [vmem:[%s2811_s2 + $0xc8] sm:$0xff]  ;;  %v145_v8 = vld [vmem:[%s2811_s2 + $0xc0] sm:$0xff]  ;;  %v1765_v14 = vshrl.u32 %v2822_v9, 7 }
  0x4d   :  { %259 = vmatprep.subr.mxu1 %v150_v3  ;;  %v144_v10 = vld [vmem:[%s2811_s2 + $0xb8] sm:$0xff]  ;;  %v143_v11 = vld [vmem:[%s2811_s2 + $0xb0] sm:$0xff]  ;;  %v142_v12 = vld [vmem:[%s2811_s2 + $0xa8] sm:$0xff] }
  0x4e   :  { %260 = vmatpush1.msra.mxu1 %v149_v4  ;;  %v141_v13 = vld [vmem:[%s2811_s2 + $0xa0] sm:$0xff]  ;;  %2844 = vst [vmem:[#allocation19_spill] sm:$0xff] %v1765_v14  ;;  %v140_v15 = vld [vmem:[%s2811_s2 + $0x98] sm:$0xff]  ;;  %v139_v18 = vld [vmem:[%s2811_s2 + $0x90] sm:$0xff]  ;;  %v1780_v25 = vsub.s32 1, %v1765_v14  ;;  %v1939_v2 = vsub.s32 0, %v1765_v14 }
  0x4f   :  { %261 = vmatprep.subr.mxu1 %v148_v5  ;;  %v169_v16 = vld [vmem:[#allocation5 + $0x38] sm:$0xff]  ;;  %v168_v17 = vld [vmem:[#allocation5 + $0x30] sm:$0xff]  ;;  %v167_v19 = vld [vmem:[#allocation5 + $0x28] sm:$0xff] }
  0x50   :  { %262 = vmatpush1.msra.mxu1 %v147_v6  ;;  %198 = vmatprep.subr.mxu0 %v169_v16  ;;  %v138_v20 = vld [vmem:[%s2811_s2 + $0x88] sm:$0xff]  ;;  %v165_v22 = vld [vmem:[#allocation5 + $0x18] sm:$0xff]  ;;  %v164_v24 = vld [vmem:[#allocation5 + $0x10] sm:$0xff]  ;;  %2845 = vst [vmem:[#allocation20_spill] sm:$0xff] %v1939_v2 }
  0x51   :  { %263 = vmatprep.subr.mxu1 %v146_v7  ;;  %199 = vmatpush1.msra.mxu0 %v168_v17  ;;  %v166_v21 = vld [vmem:[#allocation5 + $0x20] sm:$0xff]  ;;  %v136_v26 = vld [vmem:[%s2811_s2 + $0x78] sm:$0xff]  ;;  %v163_v27 = vld [vmem:[#allocation5 + $0x8] sm:$0xff] }
  0x52   :  { %264 = vmatpush1.msra.mxu1 %v145_v8  ;;  %v137_v23 = vld [vmem:[%s2811_s2 + $0x80] sm:$0xff]  ;;  %200 = vmatprep.subr.mxu0 %v167_v19  ;;  %v135_v28 = vld [vmem:[%s2811_s2 + $0x70] sm:$0xff]  ;;  %v134_v30 = vld [vmem:[%s2811_s2 + $0x68] sm:$0xff] }
  0x53   :  { %265 = vmatprep.subr.mxu1 %v144_v10  ;;  %201 = vmatpush1.msra.mxu0 %v166_v21  ;;  %v162_v29 = vld [vmem:[#allocation5] sm:$0xff]  ;;  %v161_v31 = vld [vmem:[%s2810_s1] sm:$0x1]  ;;  %v132_v35 = vld [vmem:[%s2811_s2 + $0x58] sm:$0xff] }
  0x54   :  { %266 = vmatpush1.msra.mxu1 %v143_v11  ;;  %202 = vmatprep.subr.mxu0 %v165_v22  ;;  %v1794_v32 = vld [vmem:[#allocation2] sm:$0x3]  ;;  %v1807_v36 = vld [vmem:[%s2814_s5 + $0xf8] sm:$0xff]  ;;  %v131_v37 = vld [vmem:[%s2811_s2 + $0x50] sm:$0xff] }
  0x55   :  { %267 = vmatprep.subr.mxu1 %v142_v12  ;;  %203 = vmatpush1.msra.mxu0 %v164_v24  ;;  %v133_v33 = vld [vmem:[%s2811_s2 + $0x60] sm:$0xff]  ;;  %v253_v34 = vrot.slane %v1794_v32, %v1780_v25  ;;  %v1816_v38 = vld [vmem:[%s2814_s5 + $0xf0] sm:$0xff]  ;;  %v130_v39 = vld [vmem:[%s2811_s2 + $0x48] sm:$0xff]  ;;  %v249_v12 = vrot.slane %v1794_v32, %v1939_v2 }
  0x56   :  { %268 = vmatpush1.msra.mxu1 %v141_v13  ;;  %204 = vmatprep.subr.mxu0 %v163_v27  ;;  %v1825_v40 = vld [vmem:[%s2814_s5 + $0xe8] sm:$0xff]  ;;  %v129_v41 = vld [vmem:[%s2811_s2 + $0x40] sm:$0xff]  ;;  %v128_v43 = vld [vmem:[%s2811_s2 + $0x38] sm:$0xff] }
  0x57   :  { %269 = vmatprep.subr.mxu1 %v140_v15  ;;  %205 = vmatpush1.msra.mxu0 %v162_v29  ;;  %v1834_v42 = vld [vmem:[%s2814_s5 + $0xe0] sm:$0xff]  ;;  %v1843_v44 = vld [vmem:[%s2814_s5 + $0xd8] sm:$0xff]  ;;  %v127_v45 = vld [vmem:[%s2811_s2 + $0x30] sm:$0xff] }
  0x58   :  { %270 = vmatpush1.msra.mxu1 %v139_v18  ;;  %1417 = vmatmul.mubr.msk.f32.vlgmr.msra.gmra.mxu0 %vm170_vm0, %v161_v31  ;;  %v1852_v46 = vld [vmem:[%s2814_s5 + $0xd0] sm:$0xff]  ;;  %v126_v47 = vld [vmem:[%s2811_s2 + $0x28] sm:$0xff]  ;;  %v125_v49 = vld [vmem:[%s2811_s2 + $0x20] sm:$0xff] }
  0x59   :  { %271 = vmatprep.subr.mxu1 %v138_v20  ;;  %1418 = vmatprep.mubr.msk.f32.mxu1 %vm170_vm0, %v253_v34  ;;  %v1861_v48 = vld [vmem:[%s2814_s5 + $0xc8] sm:$0xff]  ;;  %v1870_v50 = vld [vmem:[%s2814_s5 + $0xc0] sm:$0xff]  ;;  %v124_v51 = vld [vmem:[%s2811_s2 + $0x18] sm:$0xff] }
  0x5a   :  { %272 = vmatpush1.msra.mxu1 %v137_v23  ;;  %406 = vmatprep.subr.mxu0 %v1807_v36  ;;  %v1879_v52 = vld [vmem:[%s2814_s5 + $0xb8] sm:$0xff]  ;;  %v123_v53 = vld [vmem:[%s2811_s2 + $0x10] sm:$0xff]  ;;  %v122_v55 = vld [vmem:[%s2811_s2 + $0x8] sm:$0xff] }
  0x5b   :  { %273 = vmatprep.subr.mxu1 %v136_v26  ;;  %407 = vmatpush1.msra.mxu0 %v1816_v38  ;;  %v1888_v54 = vld [vmem:[%s2814_s5 + $0xb0] sm:$0xff]  ;;  %v1897_v56 = vld [vmem:[%s2814_s5 + $0xa8] sm:$0xff]  ;;  %v121_v57 = vld [vmem:[%s2811_s2] sm:$0xff] }
  0x5c   :  { %274 = vmatpush1.msra.mxu1 %v135_v28  ;;  %408 = vmatprep.subr.mxu0 %v1825_v40  ;;  %v1906_v58 = vld [vmem:[%s2814_s5 + $0xa0] sm:$0xff]  ;;  %v160_v59 = vld [vmem:[%s2811_s2 + $0x138] sm:$0xff]  ;;  %v159_v61 = vld [vmem:[%s2811_s2 + $0x130] sm:$0xff] }
  0x5d   :  { %275 = vmatprep.subr.mxu1 %v134_v30  ;;  %409 = vmatpush1.msra.mxu0 %v1834_v42  ;;  %v1915_v60 = vld [vmem:[%s2814_s5 + $0x98] sm:$0xff]  ;;  %v1924_v62 = vld [vmem:[%s2814_s5 + $0x90] sm:$0xff]  ;;  %v158_v63 = vld [vmem:[%s2811_s2 + $0x128] sm:$0xff] }
  0x5e   :  { %276 = vmatpush1.msra.mxu1 %v133_v33  ;;  %410 = vmatprep.subr.mxu0 %v1843_v44  ;;  %v1933_v0 = vld [vmem:[%s2814_s5 + $0x88] sm:$0xff]  ;;  %v157_v1 = vld [vmem:[%s2811_s2 + $0x120] sm:$0xff]  ;;  %v156_v4 = vld [vmem:[%s2811_s2 + $0x118] sm:$0xff] }
  0x5f   :  { %277 = vmatprep.subr.mxu1 %v132_v35  ;;  %411 = vmatpush1.msra.mxu0 %v1852_v46  ;;  %v1945_v3 = vld [vmem:[%s2814_s5 + $0x80] sm:$0xff]  ;;  %v1954_v5 = vld [vmem:[%s2814_s5 + $0x78] sm:$0xff]  ;;  %v155_v6 = vld [vmem:[%s2811_s2 + $0x110] sm:$0xff] }
  0x60   :  { %278 = vmatpush1.msra.mxu1 %v131_v37  ;;  %412 = vmatprep.subr.mxu0 %v1861_v48  ;;  %v1963_v7 = vld [vmem:[%s2814_s5 + $0x70] sm:$0xff]  ;;  %v154_v8 = vld [vmem:[%s2811_s2 + $0x108] sm:$0xff]  ;;  %v153_v11 = vld [vmem:[%s2811_s2 + $0x100] sm:$0xff] }
  0x61   :  { %279 = vmatprep.subr.mxu1 %v130_v39  ;;  %413 = vmatpush1.msra.mxu0 %v1870_v50  ;;  %v1972_v10 = vld [vmem:[%s2814_s5 + $0x68] sm:$0xff]  ;;  %v1983_v13 = vld [vmem:[%s2814_s5 + $0x60] sm:$0xff]  ;;  %v1989_v15 = vld [vmem:[%s2814_s5 + $0x58] sm:$0xff] }
  0x62   :  { %280 = vmatpush1.msra.mxu1 %v129_v41  ;;  %414 = vmatprep.subr.mxu0 %v1879_v52  ;;  %v1995_v16 = vld [vmem:[%s2814_s5 + $0x50] sm:$0xff]  ;;  %v2001_v17 = vld [vmem:[%s2814_s5 + $0x48] sm:$0xff]  ;;  %v2007_v18 = vld [vmem:[%s2814_s5 + $0x40] sm:$0xff] }
  0x63   :  { %281 = vmatprep.subr.mxu1 %v128_v43  ;;  %415 = vmatpush1.msra.mxu0 %v1888_v54  ;;  %v2013_v19 = vld [vmem:[%s2814_s5 + $0x38] sm:$0xff]  ;;  %v2020_v20 = vld [vmem:[%s2814_s5 + $0x30] sm:$0xff]  ;;  %v2027_v21 = vld [vmem:[%s2814_s5 + $0x28] sm:$0xff] }
  0x64   :  { %282 = vmatpush1.msra.mxu1 %v127_v45  ;;  %416 = vmatprep.subr.mxu0 %v1897_v56  ;;  %v2034_v22 = vld [vmem:[%s2814_s5 + $0x20] sm:$0xff]  ;;  %v2041_v23 = vld [vmem:[%s2814_s5 + $0x18] sm:$0xff]  ;;  %v2048_v24 = vld [vmem:[%s2814_s5 + $0x10] sm:$0xff] }
  0x65   :  { %283 = vmatprep.subr.mxu1 %v126_v47  ;;  %417 = vmatpush1.msra.mxu0 %v1906_v58  ;;  %v2055_v26 = vld [vmem:[%s2814_s5 + $0x8] sm:$0xff]  ;;  %v2062_v27 = vld [vmem:[%s2814_s5] sm:$0xff]  ;;  %v2069_v28 = vld [vmem:[%s2814_s5 + $0x1f8] sm:$0xff] }
  0x66   :  { %284 = vmatpush1.msra.mxu1 %v125_v49  ;;  %418 = vmatprep.subr.mxu0 %v1915_v60  ;;  %v2076_v29 = vld [vmem:[%s2814_s5 + $0x1f0] sm:$0xff]  ;;  %v2083_v30 = vld [vmem:[%s2814_s5 + $0x1e8] sm:$0xff]  ;;  %v2090_v31 = vld [vmem:[%s2814_s5 + $0x1e0] sm:$0xff] }
  0x67   :  { %285 = vmatprep.subr.mxu1 %v124_v51  ;;  %419 = vmatpush1.msra.mxu0 %v1924_v62  ;;  %v401_v32 = vld [vmem:[%s2814_s5 + $0x1d8] sm:$0xff]  ;;  %v400_v33 = vld [vmem:[%s2814_s5 + $0x1d0] sm:$0xff]  ;;  %v399_v34 = vld [vmem:[%s2814_s5 + $0x1c8] sm:$0xff] }
  0x68   :  { %286 = vmatpush1.msra.mxu1 %v123_v53  ;;  %420 = vmatprep.subr.mxu0 %v1933_v0  ;;  %v398_v35 = vld [vmem:[%s2814_s5 + $0x1c0] sm:$0xff]  ;;  %v396_v37 = vld [vmem:[%s2814_s5 + $0x1b0] sm:$0xff] }
  0x69   :  { %287 = vmatprep.subr.mxu1 %v122_v55  ;;  %421 = vmatpush1.msra.mxu0 %v1945_v3  ;;  %v394_v39 = vld [vmem:[%s2814_s5 + $0x1a0] sm:$0xff]  ;;  %v392_v41 = vld [vmem:[%s2814_s5 + $0x190] sm:$0xff] }
  0x6a   :  { %288 = vmatpush1.msra.mxu1 %v121_v57  ;;  %422 = vmatprep.subr.mxu0 %v1954_v5  ;;  %v390_v43 = vld [vmem:[%s2814_s5 + $0x180] sm:$0xff]  ;;  %v388_v45 = vld [vmem:[%s2814_s5 + $0x170] sm:$0xff] }
  0x6b   :  { %313 = vmatprep.subr.mxu1 %v160_v59  ;;  %423 = vmatpush1.msra.mxu0 %v1963_v7  ;;  %v386_v47 = vld [vmem:[%s2814_s5 + $0x160] sm:$0xff]  ;;  %v384_v49 = vld [vmem:[%s2814_s5 + $0x150] sm:$0xff] }
  0x6c   :  { %314 = vmatpush2.msra.mxu1 %v159_v61  ;;  %424 = vmatprep.subr.mxu0 %v1972_v10  ;;  %v382_v51 = vld [vmem:[%s2814_s5 + $0x140] sm:$0xff]  ;;  %v380_v53 = vld [vmem:[%s2814_s5 + $0x130] sm:$0xff] }
  0x6d   :  { %315 = vmatprep.subr.mxu1 %v158_v63  ;;  %425 = vmatpush1.msra.mxu0 %v1983_v13  ;;  %v378_v55 = vld [vmem:[%s2814_s5 + $0x120] sm:$0xff]  ;;  %v376_v57 = vld [vmem:[%s2814_s5 + $0x110] sm:$0xff] }
  0x6e   :  { %316 = vmatpush2.msra.mxu1 %v157_v1  ;;  %426 = vmatprep.subr.mxu0 %v1989_v15  ;;  %v374_v59 = vld [vmem:[%s2814_s5 + $0x100] sm:$0xff] }
  0x6f   :  { %317 = vmatprep.subr.mxu1 %v156_v4  ;;  %427 = vmatpush1.msra.mxu0 %v1995_v16  ;;  %v328_v61 = vld [vmem:[%s2813_s4] ss:$4 sm:$0x3] }
  0x70   :  { %318 = vmatpush2.msra.mxu1 %v155_v6  ;;  %428 = vmatprep.subr.mxu0 %v2001_v17  ;;  %v337_v63 = vrot.slane %v328_v61, %v1780_v25 }
  0x71   :  { %319 = vmatprep.subr.mxu1 %v154_v8  ;;  %429 = vmatpush1.msra.mxu0 %v2007_v18 }
  0x72   :  { %320 = vmatpush2.msra.mxu1 %v153_v11  ;;  %430 = vmatprep.subr.mxu0 %v2013_v19 }
  0x73   :  { %322 = vmatmul.mubr.f32.vlgmr.msra.gmra.mxu1 %v249_v12  ;;  %481 = vmatprep.subr.mxu1 %v1807_v36  ;;  %v397_v36 = vld [vmem:[%s2814_s5 + $0x1b8] sm:$0xff] }
  0x74   :  { %482 = vmatpush1.msra.mxu1 %v1816_v38  ;;  %431 = vmatpush1.msra.mxu0 %v2020_v20  ;;  %v395_v38 = vld [vmem:[%s2814_s5 + $0x1a8] sm:$0xff] }
  0x75   :  { %483 = vmatprep.subr.mxu1 %v1825_v40  ;;  %432 = vmatprep.subr.mxu0 %v2027_v21  ;;  %v393_v40 = vld [vmem:[%s2814_s5 + $0x198] sm:$0xff] }
  0x76   :  { %484 = vmatpush1.msra.mxu1 %v1834_v42  ;;  %433 = vmatpush1.msra.mxu0 %v2034_v22  ;;  %v391_v42 = vld [vmem:[%s2814_s5 + $0x188] sm:$0xff] }
  0x77   :  { %485 = vmatprep.subr.mxu1 %v1843_v44  ;;  %434 = vmatprep.subr.mxu0 %v2041_v23  ;;  %v389_v44 = vld [vmem:[%s2814_s5 + $0x178] sm:$0xff] }
  0x78   :  { %486 = vmatpush1.msra.mxu1 %v1852_v46  ;;  %435 = vmatpush1.msra.mxu0 %v2048_v24  ;;  %v387_v46 = vld [vmem:[%s2814_s5 + $0x168] sm:$0xff] }
  0x79   :  { %487 = vmatprep.subr.mxu1 %v1861_v48  ;;  %436 = vmatprep.subr.mxu0 %v2055_v26  ;;  %v385_v48 = vld [vmem:[%s2814_s5 + $0x158] sm:$0xff] }
  0x7a   :  { %488 = vmatpush1.msra.mxu1 %v1870_v50  ;;  %437 = vmatpush1.msra.mxu0 %v2062_v27  ;;  %v383_v50 = vld [vmem:[%s2814_s5 + $0x148] sm:$0xff] }
  0x7b   :  { %489 = vmatprep.subr.mxu1 %v1879_v52  ;;  %438 = vmatprep.subr.mxu0 %v2069_v28  ;;  %v381_v52 = vld [vmem:[%s2814_s5 + $0x138] sm:$0xff] }
  0x7c   :  { %490 = vmatpush1.msra.mxu1 %v1888_v54  ;;  %439 = vmatpush2.msra.mxu0 %v2076_v29  ;;  %v379_v54 = vld [vmem:[%s2814_s5 + $0x128] sm:$0xff] }
  0x7d   :  { %491 = vmatprep.subr.mxu1 %v1897_v56  ;;  %440 = vmatprep.subr.mxu0 %v2083_v30  ;;  %v377_v56 = vld [vmem:[%s2814_s5 + $0x118] sm:$0xff] }
  0x7e   :  { %492 = vmatpush1.msra.mxu1 %v1906_v58  ;;  %441 = vmatpush2.msra.mxu0 %v2090_v31  ;;  %v375_v58 = vld [vmem:[%s2814_s5 + $0x108] sm:$0xff] }
  0x7f   :  { %493 = vmatprep.subr.mxu1 %v1915_v60  ;;  %442 = vmatprep.subr.mxu0 %v401_v32 }
  0x80   :  { %494 = vmatpush1.msra.mxu1 %v1924_v62  ;;  %443 = vmatpush2.msra.mxu0 %v400_v33 }
  0x81   :  { %495 = vmatprep.subr.mxu1 %v1933_v0  ;;  %444 = vmatprep.subr.mxu0 %v399_v34 }
  0x82   :  { %496 = vmatpush1.msra.mxu1 %v1945_v3  ;;  %445 = vmatpush2.msra.mxu0 %v398_v35  ;;  %v333_v3 = vrot.slane %v328_v61, %v1939_v2  ;;  %v661_v61 = vld [vmem:[#allocation7 + $0x198] sm:$0xff] }
  0x83   :  { %497 = vmatprep.subr.mxu1 %v1954_v5  ;;  %446 = vmatprep.subr.mxu0 %v397_v36 }
  0x84   :  { %498 = vmatpush1.msra.mxu1 %v1963_v7  ;;  %447 = vmatpush2.msra.mxu0 %v396_v37 }
  0x85   :  { %499 = vmatprep.subr.mxu1 %v1972_v10  ;;  %448 = vmatprep.subr.mxu0 %v395_v38 }
  0x86   :  { %500 = vmatpush1.msra.mxu1 %v1983_v13  ;;  %449 = vmatpush2.msra.mxu0 %v394_v39 }
  0x87   :  { %501 = vmatprep.subr.mxu1 %v1989_v15  ;;  %450 = vmatprep.subr.mxu0 %v393_v40 }
  0x88   :  { %502 = vmatpush1.msra.mxu1 %v1995_v16  ;;  %451 = vmatpush2.msra.mxu0 %v392_v41  ;;  %v641_v16 = vld [vmem:[#allocation7 + $0xf8] sm:$0xff] }
  0x89   :  { %503 = vmatprep.subr.mxu1 %v2001_v17  ;;  %452 = vmatprep.subr.mxu0 %v391_v42  ;;  %v640_v17 = vld [vmem:[#allocation7 + $0xf0] sm:$0xff] }
  0x8a   :  { %504 = vmatpush1.msra.mxu1 %v2007_v18  ;;  %453 = vmatpush2.msra.mxu0 %v390_v43  ;;  %v639_v18 = vld [vmem:[#allocation7 + $0xe8] sm:$0xff] }
  0x8b   :  { %505 = vmatprep.subr.mxu1 %v2013_v19  ;;  %454 = vmatprep.subr.mxu0 %v389_v44  ;;  %v638_v19 = vld [vmem:[#allocation7 + $0xe0] sm:$0xff] }
  0x8c   :  { %506 = vmatpush1.msra.mxu1 %v2020_v20  ;;  %455 = vmatpush2.msra.mxu0 %v388_v45  ;;  %v637_v20 = vld [vmem:[#allocation7 + $0xd8] sm:$0xff] }
  0x8d   :  { %507 = vmatprep.subr.mxu1 %v2027_v21  ;;  %456 = vmatprep.subr.mxu0 %v387_v46  ;;  %v636_v21 = vld [vmem:[#allocation7 + $0xd0] sm:$0xff] }
  0x8e   :  { %508 = vmatpush1.msra.mxu1 %v2034_v22  ;;  %457 = vmatpush2.msra.mxu0 %v386_v47  ;;  %v635_v22 = vld [vmem:[#allocation7 + $0xc8] sm:$0xff] }
  0x8f   :  { %509 = vmatprep.subr.mxu1 %v2041_v23  ;;  %458 = vmatprep.subr.mxu0 %v385_v48  ;;  %v634_v23 = vld [vmem:[#allocation7 + $0xc0] sm:$0xff] }
  0x90   :  { %510 = vmatpush1.msra.mxu1 %v2048_v24  ;;  %459 = vmatpush2.msra.mxu0 %v384_v49  ;;  %v633_v24 = vld [vmem:[#allocation7 + $0xb8] sm:$0xff] }
  0x91   :  { %511 = vmatprep.subr.mxu1 %v2055_v26  ;;  %460 = vmatprep.subr.mxu0 %v383_v50  ;;  %v632_v26 = vld [vmem:[#allocation7 + $0xb0] sm:$0xff] }
  0x92   :  { %512 = vmatpush1.msra.mxu1 %v2062_v27  ;;  %461 = vmatpush2.msra.mxu0 %v382_v51  ;;  %v631_v27 = vld [vmem:[#allocation7 + $0xa8] sm:$0xff] }
  0x93   :  { %513 = vmatprep.subr.mxu1 %v2069_v28  ;;  %462 = vmatprep.subr.mxu0 %v381_v52  ;;  %v630_v28 = vld [vmem:[#allocation7 + $0xa0] sm:$0xff] }
  0x94   :  { %514 = vmatpush2.msra.mxu1 %v2076_v29  ;;  %463 = vmatpush2.msra.mxu0 %v380_v53  ;;  %v629_v29 = vld [vmem:[#allocation7 + $0x98] sm:$0xff] }
  0x95   :  { %515 = vmatprep.subr.mxu1 %v2083_v30  ;;  %464 = vmatprep.subr.mxu0 %v379_v54  ;;  %v628_v30 = vld [vmem:[#allocation7 + $0x90] sm:$0xff] }
  0x96   :  { %516 = vmatpush2.msra.mxu1 %v2090_v31  ;;  %465 = vmatpush2.msra.mxu0 %v378_v55  ;;  %v627_v31 = vld [vmem:[#allocation7 + $0x88] sm:$0xff] }
  0x97   :  { %517 = vmatprep.subr.mxu1 %v401_v32  ;;  %466 = vmatprep.subr.mxu0 %v377_v56  ;;  %v626_v32 = vld [vmem:[#allocation7 + $0x80] sm:$0xff] }
  0x98   :  { %518 = vmatpush2.msra.mxu1 %v400_v33  ;;  %467 = vmatpush2.msra.mxu0 %v376_v57  ;;  %v625_v33 = vld [vmem:[#allocation7 + $0x78] sm:$0xff] }
  0x99   :  { %519 = vmatprep.subr.mxu1 %v399_v34  ;;  %468 = vmatprep.subr.mxu0 %v375_v58  ;;  %v624_v34 = vld [vmem:[#allocation7 + $0x70] sm:$0xff] }
  0x9a   :  { %520 = vmatpush2.msra.mxu1 %v398_v35  ;;  %469 = vmatpush2.msra.mxu0 %v374_v59  ;;  %v623_v35 = vld [vmem:[#allocation7 + $0x68] sm:$0xff] }
  0x9b   :  { %521 = vmatprep.subr.mxu1 %v397_v36  ;;  %686 = vmatprep.subr.mxu0 %v641_v16  ;;  %v622_v36 = vld [vmem:[#allocation7 + $0x60] sm:$0xff]  ;;  %v647_v16 = vld [vmem:[#allocation7 + $0x128] sm:$0xff] }
  0x9c   :  { %522 = vmatpush2.msra.mxu1 %v396_v37  ;;  %v621_v37 = vld [vmem:[#allocation7 + $0x58] sm:$0xff] }
  0x9d   :  { %523 = vmatprep.subr.mxu1 %v395_v38  ;;  %v620_v38 = vld [vmem:[#allocation7 + $0x50] sm:$0xff] }
  0x9e   :  { %524 = vmatpush2.msra.mxu1 %v394_v39  ;;  %v619_v39 = vld [vmem:[#allocation7 + $0x48] sm:$0xff] }
  0x9f   :  { %525 = vmatprep.subr.mxu1 %v393_v40  ;;  %v618_v40 = vld [vmem:[#allocation7 + $0x40] sm:$0xff] }
  0xa0   :  { %526 = vmatpush2.msra.mxu1 %v392_v41  ;;  %v617_v41 = vld [vmem:[#allocation7 + $0x38] sm:$0xff] }
  0xa1   :  { %527 = vmatprep.subr.mxu1 %v391_v42  ;;  %v616_v42 = vld [vmem:[#allocation7 + $0x30] sm:$0xff] }
  0xa2   :  { %528 = vmatpush2.msra.mxu1 %v390_v43  ;;  %v615_v43 = vld [vmem:[#allocation7 + $0x28] sm:$0xff] }
  0xa3   :  { %529 = vmatprep.subr.mxu1 %v389_v44  ;;  %v614_v44 = vld [vmem:[#allocation7 + $0x20] sm:$0xff] }
  0xa4   :  { %530 = vmatpush2.msra.mxu1 %v388_v45  ;;  %v613_v45 = vld [vmem:[#allocation7 + $0x18] sm:$0xff] }
  0xa5   :  { %531 = vmatprep.subr.mxu1 %v387_v46  ;;  %v612_v46 = vld [vmem:[#allocation7 + $0x10] sm:$0xff] }
  0xa6   :  { %532 = vmatpush2.msra.mxu1 %v386_v47  ;;  %v611_v47 = vld [vmem:[#allocation7 + $0x8] sm:$0xff] }
  0xa7   :  { %533 = vmatprep.subr.mxu1 %v385_v48  ;;  %v610_v48 = vld [vmem:[#allocation7] sm:$0xff] }
  0xa8   :  { %534 = vmatpush2.msra.mxu1 %v384_v49  ;;  %v673_v49 = vld [vmem:[#allocation7 + $0x1f8] sm:$0xff] }
  0xa9   :  { %535 = vmatprep.subr.mxu1 %v383_v50  ;;  %v672_v50 = vld [vmem:[#allocation7 + $0x1f0] sm:$0xff] }
  0xaa   :  { %536 = vmatpush2.msra.mxu1 %v382_v51  ;;  %v671_v51 = vld [vmem:[#allocation7 + $0x1e8] sm:$0xff] }
  0xab   :  { %537 = vmatprep.subr.mxu1 %v381_v52  ;;  %v670_v52 = vld [vmem:[#allocation7 + $0x1e0] sm:$0xff] }
  0xac   :  { %538 = vmatpush2.msra.mxu1 %v380_v53  ;;  %v669_v53 = vld [vmem:[#allocation7 + $0x1d8] sm:$0xff] }
  0xad   :  { %539 = vmatprep.subr.mxu1 %v379_v54  ;;  %v668_v54 = vld [vmem:[#allocation7 + $0x1d0] sm:$0xff] }
  0xae   :  { %540 = vmatpush2.msra.mxu1 %v378_v55  ;;  %v667_v55 = vld [vmem:[#allocation7 + $0x1c8] sm:$0xff] }
  0xaf   :  { %541 = vmatprep.subr.mxu1 %v377_v56  ;;  %v666_v56 = vld [vmem:[#allocation7 + $0x1c0] sm:$0xff] }
  0xb0   :  { %542 = vmatpush2.msra.mxu1 %v376_v57  ;;  %v665_v57 = vld [vmem:[#allocation7 + $0x1b8] sm:$0xff] }
  0xb1   :  { %543 = vmatprep.subr.mxu1 %v375_v58  ;;  %v664_v58 = vld [vmem:[#allocation7 + $0x1b0] sm:$0xff] }
  0xb2   :  { %544 = vmatpush2.msra.mxu1 %v374_v59  ;;  %v663_v59 = vld [vmem:[#allocation7 + $0x1a8] sm:$0xff] }
 0x118   :  { %v240_v60 = vpop.f32.mrf.mxu0 }
 0x11a   :  { %v242_v0 = vpop.f32.mrf.mxu0 }
 0x133   :  { %v323_v62 = vpop.f32.mrf.mxu1 }
 0x134   :  { %v324_v1 = vadd.f32 %v323_v62, %v240_v60  ;;  %v662_v60 = vld [vmem:[#allocation7 + $0x1a0] sm:$0xff]  ;;  %v660_v62 = vld [vmem:[#allocation7 + $0x190] sm:$0xff] }
 0x135   :  { %v325_v4 = vpop.f32.mrf.mxu1 }
 0x136   :  { %v326_v5 = vadd.f32 %v325_v4, %v242_v0  ;;  %v340_v7 = vadd.f32 %v333_v3, %v324_v1  ;;  %v658_v0 = vld [vmem:[#allocation7 + $0x180] sm:$0xff]  ;;  %v657_v1 = vld [vmem:[#allocation7 + $0x178] sm:$0xff]  ;;  %v656_v3 = vld [vmem:[#allocation7 + $0x170] sm:$0xff] }
 0x137   :  { %v655_v4 = vld [vmem:[#allocation7 + $0x168] sm:$0xff] }
 0x138   :  { %v341_v6 = vadd.f32 %v337_v63, %v326_v5  ;;  %v659_v63 = vld [vmem:[#allocation7 + $0x188] sm:$0xff]  ;;  %v654_v5 = vld [vmem:[#allocation7 + $0x160] sm:$0xff] }
 0x13a   :  { %470 = vmatprep.mubr.f32.mxu0 %v341_v6 }
 0x13b   :  { %471 = vmatmul.mubr.f32.vlgmr.msra.gmra.mxu0 %v340_v7 }
 0x13c   :  { %687 = vmatpush1.msra.mxu0 %v640_v17  ;;  %v646_v17 = vld [vmem:[#allocation7 + $0x120] sm:$0xff] }
 0x13d   :  { %688 = vmatprep.subr.mxu0 %v639_v18  ;;  %v645_v18 = vld [vmem:[#allocation7 + $0x118] sm:$0xff] }
 0x13e   :  { %689 = vmatpush1.msra.mxu0 %v638_v19  ;;  %v644_v19 = vld [vmem:[#allocation7 + $0x110] sm:$0xff] }
 0x13f   :  { %690 = vmatprep.subr.mxu0 %v637_v20  ;;  %v643_v20 = vld [vmem:[#allocation7 + $0x108] sm:$0xff] }
 0x140   :  { %691 = vmatpush1.msra.mxu0 %v636_v21  ;;  %v642_v21 = vld [vmem:[#allocation7 + $0x100] sm:$0xff] }
 0x141   :  { %692 = vmatprep.subr.mxu0 %v635_v22  ;;  %v788_v22 = vld [vmem:[#allocation10 + $0xf8] sm:$0xff] }
 0x142   :  { %693 = vmatpush1.msra.mxu0 %v634_v23  ;;  %v2217_v23 = vld [vmem:[#allocation10 + $0xf0] sm:$0xff]  ;;  %821 = vmatprep.subr.mxu1 %v788_v22 }
 0x143   :  { %694 = vmatprep.subr.mxu0 %v633_v24  ;;  %v2219_v24 = vld [vmem:[#allocation10 + $0xe8] sm:$0xff] }
 0x144   :  { %695 = vmatpush1.msra.mxu0 %v632_v26  ;;  %v2221_v26 = vld [vmem:[#allocation10 + $0xe0] sm:$0xff] }
 0x145   :  { %696 = vmatprep.subr.mxu0 %v631_v27  ;;  %v2224_v27 = vld [vmem:[#allocation10 + $0xd8] sm:$0xff] }
 0x146   :  { %697 = vmatpush1.msra.mxu0 %v630_v28  ;;  %v2227_v28 = vld [vmem:[#allocation10 + $0xd0] sm:$0xff] }
 0x147   :  { %698 = vmatprep.subr.mxu0 %v629_v29  ;;  %v2230_v29 = vld [vmem:[#allocation10 + $0xc8] sm:$0xff] }
 0x148   :  { %699 = vmatpush1.msra.mxu0 %v628_v30  ;;  %v2233_v30 = vld [vmem:[#allocation10 + $0xc0] sm:$0xff] }
 0x149   :  { %700 = vmatprep.subr.mxu0 %v627_v31  ;;  %v2236_v31 = vld [vmem:[#allocation10 + $0xb8] sm:$0xff] }
 0x14a   :  { %701 = vmatpush1.msra.mxu0 %v626_v32  ;;  %v2239_v32 = vld [vmem:[#allocation10 + $0xb0] sm:$0xff] }
 0x14b   :  { %702 = vmatprep.subr.mxu0 %v625_v33  ;;  %v2242_v33 = vld [vmem:[#allocation10 + $0xa8] sm:$0xff] }
 0x14c   :  { %703 = vmatpush1.msra.mxu0 %v624_v34  ;;  %v2245_v34 = vld [vmem:[#allocation10 + $0xa0] sm:$0xff] }
 0x14d   :  { %704 = vmatprep.subr.mxu0 %v623_v35  ;;  %v2248_v35 = vld [vmem:[#allocation10 + $0x98] sm:$0xff] }
 0x14e   :  { %705 = vmatpush1.msra.mxu0 %v622_v36  ;;  %v2251_v36 = vld [vmem:[#allocation10 + $0x90] sm:$0xff] }
 0x14f   :  { %706 = vmatprep.subr.mxu0 %v621_v37  ;;  %v2254_v37 = vld [vmem:[#allocation10 + $0x88] sm:$0xff] }
 0x150   :  { %707 = vmatpush1.msra.mxu0 %v620_v38  ;;  %v2257_v38 = vld [vmem:[#allocation10 + $0x80] sm:$0xff] }
 0x151   :  { %708 = vmatprep.subr.mxu0 %v619_v39  ;;  %v2260_v39 = vld [vmem:[#allocation10 + $0x78] sm:$0xff] }
 0x152   :  { %709 = vmatpush1.msra.mxu0 %v618_v40  ;;  %v2263_v40 = vld [vmem:[#allocation10 + $0x70] sm:$0xff] }
 0x153   :  { %710 = vmatprep.subr.mxu0 %v617_v41  ;;  %v2266_v41 = vld [vmem:[#allocation10 + $0x68] sm:$0xff] }
 0x154   :  { %711 = vmatpush1.msra.mxu0 %v616_v42  ;;  %v2269_v42 = vld [vmem:[#allocation10 + $0x60] sm:$0xff] }
 0x155   :  { %712 = vmatprep.subr.mxu0 %v615_v43  ;;  %v2272_v43 = vld [vmem:[#allocation10 + $0x58] sm:$0xff] }
 0x156   :  { %713 = vmatpush1.msra.mxu0 %v614_v44  ;;  %v2275_v44 = vld [vmem:[#allocation10 + $0x50] sm:$0xff] }
 0x157   :  { %714 = vmatprep.subr.mxu0 %v613_v45  ;;  %v2278_v45 = vld [vmem:[#allocation10 + $0x48] sm:$0xff] }
 0x158   :  { %715 = vmatpush1.msra.mxu0 %v612_v46  ;;  %v2281_v46 = vld [vmem:[#allocation10 + $0x40] sm:$0xff] }
 0x159   :  { %716 = vmatprep.subr.mxu0 %v611_v47  ;;  %v2284_v47 = vld [vmem:[#allocation10 + $0x38] sm:$0xff] }
 0x15a   :  { %717 = vmatpush1.msra.mxu0 %v610_v48  ;;  %v2287_v48 = vld [vmem:[#allocation10 + $0x30] sm:$0xff] }
 0x15b   :  { %718 = vmatprep.subr.mxu0 %v673_v49  ;;  %v2290_v49 = vld [vmem:[#allocation10 + $0x28] sm:$0xff] }
 0x15c   :  { %719 = vmatpush2.msra.mxu0 %v672_v50  ;;  %v2293_v50 = vld [vmem:[#allocation10 + $0x20] sm:$0xff] }
 0x15d   :  { %720 = vmatprep.subr.mxu0 %v671_v51  ;;  %v2296_v51 = vld [vmem:[#allocation10 + $0x18] sm:$0xff] }
 0x15e   :  { %721 = vmatpush2.msra.mxu0 %v670_v52  ;;  %v2299_v52 = vld [vmem:[#allocation10 + $0x10] sm:$0xff] }
 0x15f   :  { %722 = vmatprep.subr.mxu0 %v669_v53  ;;  %v2302_v53 = vld [vmem:[#allocation10 + $0x8] sm:$0xff] }
 0x160   :  { %723 = vmatpush2.msra.mxu0 %v668_v54  ;;  %v2305_v54 = vld [vmem:[#allocation10] sm:$0xff] }
 0x161   :  { %724 = vmatprep.subr.mxu0 %v667_v55  ;;  %v2308_v55 = vld [vmem:[#allocation10 + $0x1f8] sm:$0xff] }
 0x162   :  { %725 = vmatpush2.msra.mxu0 %v666_v56  ;;  %v2311_v56 = vld [vmem:[#allocation10 + $0x1f0] sm:$0xff] }
 0x163   :  { %726 = vmatprep.subr.mxu0 %v665_v57  ;;  %v2314_v57 = vld [vmem:[#allocation10 + $0x1e8] sm:$0xff] }
 0x164   :  { %727 = vmatpush2.msra.mxu0 %v664_v58  ;;  %v2317_v58 = vld [vmem:[#allocation10 + $0x1e0] sm:$0xff] }
 0x165   :  { %728 = vmatprep.subr.mxu0 %v663_v59  ;;  %v2320_v59 = vld [vmem:[#allocation10 + $0x1d8] sm:$0xff] }
 0x166   :  { %729 = vmatpush2.msra.mxu0 %v662_v60  ;;  %v2323_v60 = vld [vmem:[#allocation10 + $0x1d0] sm:$0xff] }
 0x167   :  { %730 = vmatprep.subr.mxu0 %v661_v61  ;;  %v2326_v61 = vld [vmem:[#allocation10 + $0x1c8] sm:$0xff] }
 0x168   :  { %731 = vmatpush2.msra.mxu0 %v660_v62  ;;  %v2329_v62 = vld [vmem:[#allocation10 + $0x1c0] sm:$0xff] }
 0x169   :  { %732 = vmatprep.subr.mxu0 %v659_v63  ;;  %v2332_v63 = vld [vmem:[#allocation10 + $0x1b8] sm:$0xff] }
 0x16a   :  { %733 = vmatpush2.msra.mxu0 %v658_v0  ;;  %2846 = vst [vmem:[#allocation21_spill] sm:$0xff] %v2332_v63  ;;  %v2335_v0 = vld [vmem:[#allocation10 + $0x1b0] sm:$0xff] }
 0x16b   :  { %734 = vmatprep.subr.mxu0 %v657_v1  ;;  %2847 = vst [vmem:[#allocation22_spill] sm:$0xff] %v2335_v0  ;;  %v2338_v1 = vld [vmem:[#allocation10 + $0x1a8] sm:$0xff] }
 0x16c   :  { %735 = vmatpush2.msra.mxu0 %v656_v3  ;;  %2848 = vst [vmem:[#allocation23_spill] sm:$0xff] %v2338_v1  ;;  %v2341_v3 = vld [vmem:[#allocation10 + $0x1a0] sm:$0xff] }
 0x16d   :  { %736 = vmatprep.subr.mxu0 %v655_v4  ;;  %2849 = vst [vmem:[#allocation24_spill] sm:$0xff] %v2341_v3  ;;  %v2344_v4 = vld [vmem:[#allocation10 + $0x198] sm:$0xff] }
 0x16e   :  { %737 = vmatpush2.msra.mxu0 %v654_v5  ;;  %2850 = vst [vmem:[#allocation25_spill] sm:$0xff] %v2344_v4  ;;  %v2347_v5 = vld [vmem:[#allocation10 + $0x190] sm:$0xff] }
 0x16f   :  { %2851 = vst [vmem:[#allocation26_spill] sm:$0xff] %v2347_v5 }
 0x1fb   :  { %v472_v8 = vpop.f32.mrf.mxu0 }
 0x1fc   :  { %v2209_v10 = vsub.f32 %v340_v7, %v472_v8  ;;  %v652_v7 = vld [vmem:[#allocation7 + $0x150] sm:$0xff]  ;;  %v651_v8 = vld [vmem:[#allocation7 + $0x148] sm:$0xff] }
 0x1fd   :  { %v474_v11 = vpop.f32.mrf.mxu0 }
 0x1fe   :  { %v2211_v12 = vsub.f32 %v341_v6, %v474_v11  ;;  %v479_v15 = vmul.f32 %v2209_v10, %v2209_v10  ;;  %v653_v6 = vld [vmem:[#allocation7 + $0x158] sm:$0xff]  ;;  %v650_v11 = vld [vmem:[#allocation7 + $0x140] sm:$0xff] }
 0x1ff   :  { %738 = vmatprep.subr.mxu0 %v653_v6  ;;  %v2350_v6 = vld [vmem:[#allocation10 + $0x188] sm:$0xff] }
 0x200   :  { %v480_v13 = vmul.f32 %v2211_v12, %v2211_v12  ;;  %739 = vmatpush2.msra.mxu0 %v652_v7  ;;  %2852 = vst [vmem:[#allocation27_spill] sm:$0xff] %v2350_v6  ;;  %v2353_v7 = vld [vmem:[#allocation10 + $0x180] sm:$0xff] }
 0x201   :  { %740 = vmatprep.subr.mxu0 %v651_v8  ;;  %2853 = vst [vmem:[#allocation28_spill] sm:$0xff] %v2353_v7  ;;  %v2356_v8 = vld [vmem:[#allocation10 + $0x178] sm:$0xff] }
 0x202   :  { %545 = vmatprep.mubr.f32.mxu1 %v480_v13  ;;  %v649_v13 = vld [vmem:[#allocation7 + $0x138] sm:$0xff]  ;;  %741 = vmatpush2.msra.mxu0 %v650_v11  ;;  %2854 = vst [vmem:[#allocation29_spill] sm:$0xff] %v2356_v8 }
 0x203   :  { %546 = vmatmul.mubr.f32.vlgmr.msra.gmra.mxu1 %v479_v15  ;;  %v648_v15 = vld [vmem:[#allocation7 + $0x130] sm:$0xff]  ;;  %742 = vmatprep.subr.mxu0 %v649_v13  ;;  %v2359_v11 = vld [vmem:[#allocation10 + $0x170] sm:$0xff] }
 0x204   :  { %743 = vmatpush2.msra.mxu0 %v648_v15  ;;  %822 = vmatpush1.msra.mxu1 %v2217_v23  ;;  %2855 = vst [vmem:[#allocation30_spill] sm:$0xff] %v2359_v11  ;;  %v2362_v13 = vld [vmem:[#allocation10 + $0x168] sm:$0xff]  ;;  %v2365_v15 = vld [vmem:[#allocation10 + $0x160] sm:$0xff] }
 0x205   :  { %744 = vmatprep.subr.mxu0 %v647_v16  ;;  %823 = vmatprep.subr.mxu1 %v2219_v24  ;;  %2856 = vst [vmem:[#allocation31_spill] sm:$0xff] %v2362_v13  ;;  %2857 = vst [vmem:[#allocation32_spill] sm:$0xff] %v2365_v15  ;;  %v2368_v16 = vld [vmem:[#allocation10 + $0x158] sm:$0xff] }
 0x206   :  { %745 = vmatpush2.msra.mxu0 %v646_v17  ;;  %824 = vmatpush1.msra.mxu1 %v2221_v26  ;;  %2858 = vst [vmem:[#allocation33_spill] sm:$0xff] %v2368_v16  ;;  %v2371_v17 = vld [vmem:[#allocation10 + $0x150] sm:$0xff] }
 0x207   :  { %746 = vmatprep.subr.mxu0 %v645_v18  ;;  %825 = vmatprep.subr.mxu1 %v2224_v27  ;;  %2859 = vst [vmem:[#allocation34_spill] sm:$0xff] %v2371_v17  ;;  %v2374_v18 = vld [vmem:[#allocation10 + $0x148] sm:$0xff] }
 0x208   :  { %747 = vmatpush2.msra.mxu0 %v644_v19  ;;  %826 = vmatpush1.msra.mxu1 %v2227_v28  ;;  %2860 = vst [vmem:[#allocation35_spill] sm:$0xff] %v2374_v18  ;;  %v2377_v19 = vld [vmem:[#allocation10 + $0x140] sm:$0xff] }
 0x209   :  { %748 = vmatprep.subr.mxu0 %v643_v20  ;;  %827 = vmatprep.subr.mxu1 %v2230_v29  ;;  %2861 = vst [vmem:[#allocation36_spill] sm:$0xff] %v2377_v19  ;;  %v2380_v20 = vld [vmem:[#allocation10 + $0x138] sm:$0xff] }
 0x20a   :  { %749 = vmatpush2.msra.mxu0 %v642_v21  ;;  %828 = vmatpush1.msra.mxu1 %v2233_v30  ;;  %2862 = vst [vmem:[#allocation37_spill] sm:$0xff] %v2380_v20  ;;  %v2383_v21 = vld [vmem:[#allocation10 + $0x130] sm:$0xff] }
 0x20b   :  { %896 = vmatprep.subr.mxu0 %v788_v22  ;;  %829 = vmatprep.subr.mxu1 %v2236_v31  ;;  %2863 = vst [vmem:[#allocation38_spill] sm:$0xff] %v2383_v21 }
 0x20c   :  { %830 = vmatpush1.msra.mxu1 %v2239_v32 }
 0x20d   :  { %831 = vmatprep.subr.mxu1 %v2242_v33 }
 0x20e   :  { %832 = vmatpush1.msra.mxu1 %v2245_v34 }
 0x20f   :  { %833 = vmatprep.subr.mxu1 %v2248_v35 }
 0x210   :  { %834 = vmatpush1.msra.mxu1 %v2251_v36 }
 0x211   :  { %835 = vmatprep.subr.mxu1 %v2254_v37 }
 0x212   :  { %836 = vmatpush1.msra.mxu1 %v2257_v38 }
 0x213   :  { %837 = vmatprep.subr.mxu1 %v2260_v39 }
 0x214   :  { %838 = vmatpush1.msra.mxu1 %v2263_v40 }
 0x215   :  { %839 = vmatprep.subr.mxu1 %v2266_v41 }
 0x216   :  { %840 = vmatpush1.msra.mxu1 %v2269_v42 }
 0x217   :  { %841 = vmatprep.subr.mxu1 %v2272_v43 }
 0x218   :  { %842 = vmatpush1.msra.mxu1 %v2275_v44 }
 0x219   :  { %843 = vmatprep.subr.mxu1 %v2278_v45 }
 0x21a   :  { %844 = vmatpush1.msra.mxu1 %v2281_v46 }
 0x21b   :  { %845 = vmatprep.subr.mxu1 %v2284_v47 }
 0x21c   :  { %846 = vmatpush1.msra.mxu1 %v2287_v48 }
 0x21d   :  { %847 = vmatprep.subr.mxu1 %v2290_v49 }
 0x21e   :  { %848 = vmatpush1.msra.mxu1 %v2293_v50 }
 0x21f   :  { %849 = vmatprep.subr.mxu1 %v2296_v51 }
 0x220   :  { %850 = vmatpush1.msra.mxu1 %v2299_v52 }
 0x221   :  { %851 = vmatprep.subr.mxu1 %v2302_v53 }
 0x222   :  { %852 = vmatpush1.msra.mxu1 %v2305_v54 }
 0x223   :  { %853 = vmatprep.subr.mxu1 %v2308_v55 }
 0x224   :  { %854 = vmatpush2.msra.mxu1 %v2311_v56 }
 0x225   :  { %855 = vmatprep.subr.mxu1 %v2314_v57 }
 0x226   :  { %856 = vmatpush2.msra.mxu1 %v2317_v58 }
 0x227   :  { %857 = vmatprep.subr.mxu1 %v2320_v59 }
 0x228   :  { %858 = vmatpush2.msra.mxu1 %v2323_v60 }
 0x229   :  { %859 = vmatprep.subr.mxu1 %v2326_v61 }
 0x22a   :  { %860 = vmatpush2.msra.mxu1 %v2329_v62 }
 0x22b   :  { %861 = vmatprep.subr.mxu1 %v2332_v63 }
 0x22c   :  { %862 = vmatpush2.msra.mxu1 %v2335_v0 }
 0x22d   :  { %863 = vmatprep.subr.mxu1 %v2338_v1 }
 0x22e   :  { %864 = vmatpush2.msra.mxu1 %v2341_v3 }
 0x22f   :  { %865 = vmatprep.subr.mxu1 %v2344_v4 }
 0x230   :  { %866 = vmatpush2.msra.mxu1 %v2347_v5 }
 0x231   :  { %867 = vmatprep.subr.mxu1 %v2350_v6 }
 0x232   :  { %868 = vmatpush2.msra.mxu1 %v2353_v7 }
 0x233   :  { %869 = vmatprep.subr.mxu1 %v2356_v8 }
 0x234   :  { %870 = vmatpush2.msra.mxu1 %v2359_v11 }
 0x235   :  { %871 = vmatprep.subr.mxu1 %v2362_v13 }
 0x236   :  { %872 = vmatpush2.msra.mxu1 %v2365_v15 }
 0x237   :  { %873 = vmatprep.subr.mxu1 %v2368_v16 }
 0x238   :  { %874 = vmatpush2.msra.mxu1 %v2371_v17  ;;  %v1419_v17 = vld [vmem:[%s2813_s4 + $0x1] ss:$4 sm:$0x3] }
 0x239   :  { %875 = vmatprep.subr.mxu1 %v2374_v18  ;;  %v1420_v18 = vld [vmem:[%s2813_s4 + $0x2] ss:$4 sm:$0x3] }
 0x23a   :  { %876 = vmatpush2.msra.mxu1 %v2377_v19  ;;  %v562_v19 = vrot.slane %v1419_v17, %v1939_v2 }
 0x23b   :  { %877 = vmatprep.subr.mxu1 %v2380_v20 }
 0x23c   :  { %878 = vmatpush2.msra.mxu1 %v2383_v21  ;;  %v566_v21 = vrot.slane %v1419_v17, %v1780_v25 }
 0x2c3   :  { %v547_v22 = vpop.f32.mrf.mxu1 }
 0x2c4   :  { %v548_v9 = vadd.f32 1e-05, %v547_v22  ;;  %v577_v22 = vrot.slane %v1420_v18, %v1939_v2 }
 0x2c5   :  { %v549_v14 = vpop.f32.mrf.mxu1 }
 0x2c6   :  { %1440 = vrsqrt.f32 %v548_v9  ;;  %v550_v16 = vadd.f32 1e-05, %v549_v14 }
 0x2c8   :  { %1442 = vrsqrt.f32 %v550_v16  ;;  %v581_v16 = vrot.slane %v1420_v18, %v1780_v25 }
 0x2d3   :  { %v1441_v15 = vpop.eup %1440 }
 0x2d4   :  { %v554_v20 = vmul.f32 %v1441_v15, %v2209_v10 }
 0x2d5   :  { %v1443_v9 = vpop.eup %1442 }
 0x2d6   :  { %v555_v14 = vmul.f32 %v1443_v9, %v2211_v12  ;;  %v569_v13 = vmul.f32 %v562_v19, %v554_v20  ;;  %v1048_v9 = vld [vmem:[%s2818_s9 + $0xb8] sm:$0xff] }
 0x2d8   :  { %v570_v11 = vmul.f32 %v566_v21, %v555_v14  ;;  %v584_v8 = vadd.f32 %v577_v22, %v569_v13  ;;  %v1049_v22 = vld [vmem:[%s2818_s9 + $0xc0] sm:$0xff]  ;;  %v1047_v14 = vld [vmem:[%s2818_s9 + $0xb0] sm:$0xff] }
 0x2da   :  { %v585_v7 = vadd.f32 %v581_v16, %v570_v11  ;;  %v586_v6 = vmin.f32 %v584_v8, 20.0  ;;  %vm604_vm1 = vcmp.gt.f32.partialorder %v584_v8, 20.0  ;;  %v1046_v16 = vld [vmem:[%s2818_s9 + $0xa8] sm:$0xff] }
 0x2dc   :  { %v587_v5 = vmin.f32 %v585_v7, 20.0  ;;  %v588_v4 = vmul.f32 1.442695, %v586_v6  ;;  %vm605_vm2 = vcmp.gt.f32.partialorder %v585_v7, 20.0 }
 0x2de   :  { %v590_v3 = vmul.f32 1.442695, %v587_v5  ;;  %1444 = vpow2.f32 %v588_v4 }
 0x2e0   :  { %1446 = vpow2.f32 %v590_v3 }
 0x2eb   :  { %v1445_v10 = vpop.eup %1444 }
 0x2ec   :  { %v592_v15 = vadd.f32 1.0, %v1445_v10  ;;  %v1045_v10 = vld [vmem:[%s2818_s9 + $0xa0] sm:$0xff] }
 0x2ed   :  { %v1447_v17 = vpop.eup %1446 }
 0x2ee   :  { %v593_v1 = vadd.f32 1.0, %v1447_v17  ;;  %v594_v2 = vmul.f32 %v592_v15, %v592_v15  ;;  %v1044_v15 = vld [vmem:[%s2818_s9 + $0x98] sm:$0xff]  ;;  %v1043_v17 = vld [vmem:[%s2818_s9 + $0x90] sm:$0xff] }
 0x2f0   :  { %v595_v0 = vmul.f32 %v593_v1, %v593_v1  ;;  %v598_v63 = vadd.f32 1.0, %v594_v2  ;;  %v1421_v18 = vadd.f32 -1.0, %v594_v2  ;;  %v2864_v2 = vld [vmem:[#allocation21_spill] sm:$0xff] }
 0x2f1   :  { %v1052_v1 = vld [vmem:[%s2818_s9 + $0xd8] sm:$0xff] }
 0x2f2   :  { %v599_v12 = vadd.f32 1.0, %v595_v0  ;;  %1448 = vrcp.f32 %v598_v63  ;;  %v1422_v13 = vadd.f32 -1.0, %v595_v0  ;;  %v1054_v63 = vld [vmem:[%s2818_s9 + $0xe8] sm:$0xff]  ;;  %v1053_v0 = vld [vmem:[%s2818_s9 + $0xe0] sm:$0xff] }
 0x2f4   :  { %1450 = vrcp.f32 %v599_v12  ;;  %v1042_v12 = vld [vmem:[%s2818_s9 + $0x88] sm:$0xff] }
 0x2ff   :  { %v1449_v19 = vpop.eup %1448 }
 0x300   :  { %v601_v11 = vmul.f32 %v1449_v19, %v1421_v18  ;;  %v1041_v18 = vld [vmem:[%s2818_s9 + $0x80] sm:$0xff]  ;;  %v1040_v19 = vld [vmem:[%s2818_s9 + $0x78] sm:$0xff] }
 0x301   :  { %v1451_v20 = vpop.eup %1450 }
 0x302   :  { %v603_v21 = vmul.f32 %v1451_v20, %v1422_v13  ;;  %v606_v4 = vsel %vm604_vm1, 1.0, %v601_v11  ;;  %v1039_v13 = vld [vmem:[%s2818_s9 + $0x70] sm:$0xff]  ;;  %v1038_v11 = vld [vmem:[%s2818_s9 + $0x68] sm:$0xff]  ;;  %v1037_v20 = vld [vmem:[%s2818_s9 + $0x60] sm:$0xff] }
 0x303   :  { %v608_v6 = vmul.f32 %v606_v4, %v584_v8  ;;  %v1050_v8 = vld [vmem:[%s2818_s9 + $0xc8] sm:$0xff]  ;;  %v1035_v4 = vld [vmem:[%s2818_s9 + $0x50] sm:$0xff] }
 0x304   :  { %v607_v3 = vsel %vm605_vm2, 1.0, %v603_v21  ;;  %v1036_v21 = vld [vmem:[%s2818_s9 + $0x58] sm:$0xff] }
 0x305   :  { %v609_v5 = vmul.f32 %v607_v3, %v585_v7  ;;  %v1051_v7 = vld [vmem:[%s2818_s9 + $0xd0] sm:$0xff]  ;;  %v1034_v3 = vld [vmem:[%s2818_s9 + $0x48] sm:$0xff] }
 0x307   :  { %750 = vmatprep.mubr.f32.mxu0 %v609_v5  ;;  %v1033_v5 = vld [vmem:[%s2818_s9 + $0x40] sm:$0xff] }
 0x308   :  { %751 = vmatmul.mubr.f32.vlgmr.msra.gmra.mxu0 %v608_v6  ;;  %v1032_v6 = vld [vmem:[%s2818_s9 + $0x38] sm:$0xff] }
 0x309   :  { %897 = vmatpush1.msra.mxu0 %v2217_v23  ;;  %v2865_v23 = vld [vmem:[#allocation22_spill] sm:$0xff] }
 0x30a   :  { %898 = vmatprep.subr.mxu0 %v2219_v24  ;;  %v2866_v24 = vld [vmem:[#allocation23_spill] sm:$0xff] }
 0x30b   :  { %899 = vmatpush1.msra.mxu0 %v2221_v26  ;;  %v2867_v26 = vld [vmem:[#allocation24_spill] sm:$0xff] }
 0x30c   :  { %900 = vmatprep.subr.mxu0 %v2224_v27  ;;  %v2868_v27 = vld [vmem:[#allocation25_spill] sm:$0xff] }
 0x30d   :  { %901 = vmatpush1.msra.mxu0 %v2227_v28  ;;  %v2869_v28 = vld [vmem:[#allocation26_spill] sm:$0xff] }
 0x30e   :  { %902 = vmatprep.subr.mxu0 %v2230_v29  ;;  %v2870_v29 = vld [vmem:[#allocation27_spill] sm:$0xff] }
 0x30f   :  { %903 = vmatpush1.msra.mxu0 %v2233_v30  ;;  %v2871_v30 = vld [vmem:[#allocation28_spill] sm:$0xff] }
 0x310   :  { %904 = vmatprep.subr.mxu0 %v2236_v31  ;;  %v2872_v31 = vld [vmem:[#allocation29_spill] sm:$0xff] }
 0x311   :  { %905 = vmatpush1.msra.mxu0 %v2239_v32  ;;  %v2873_v32 = vld [vmem:[#allocation30_spill] sm:$0xff] }
 0x312   :  { %906 = vmatprep.subr.mxu0 %v2242_v33  ;;  %v2874_v33 = vld [vmem:[#allocation31_spill] sm:$0xff] }
 0x313   :  { %907 = vmatpush1.msra.mxu0 %v2245_v34  ;;  %v2875_v34 = vld [vmem:[#allocation32_spill] sm:$0xff] }
 0x314   :  { %908 = vmatprep.subr.mxu0 %v2248_v35  ;;  %v2876_v35 = vld [vmem:[#allocation33_spill] sm:$0xff] }
 0x315   :  { %909 = vmatpush1.msra.mxu0 %v2251_v36  ;;  %v2877_v36 = vld [vmem:[#allocation34_spill] sm:$0xff] }
 0x316   :  { %910 = vmatprep.subr.mxu0 %v2254_v37  ;;  %v2878_v37 = vld [vmem:[#allocation35_spill] sm:$0xff] }
 0x317   :  { %911 = vmatpush1.msra.mxu0 %v2257_v38  ;;  %v2879_v38 = vld [vmem:[#allocation36_spill] sm:$0xff] }
 0x318   :  { %912 = vmatprep.subr.mxu0 %v2260_v39  ;;  %v2880_v39 = vld [vmem:[#allocation37_spill] sm:$0xff] }
 0x319   :  { %913 = vmatpush1.msra.mxu0 %v2263_v40  ;;  %v2881_v40 = vld [vmem:[#allocation38_spill] sm:$0xff] }
 0x31a   :  { %914 = vmatprep.subr.mxu0 %v2266_v41  ;;  %v794_v41 = vld [vmem:[#allocation10 + $0x128] sm:$0xff] }
 0x31b   :  { %915 = vmatpush1.msra.mxu0 %v2269_v42  ;;  %879 = vmatprep.subr.mxu1 %v794_v41  ;;  %v793_v42 = vld [vmem:[#allocation10 + $0x120] sm:$0xff] }
 0x31c   :  { %916 = vmatprep.subr.mxu0 %v2272_v43  ;;  %880 = vmatpush2.msra.mxu1 %v793_v42  ;;  %v792_v43 = vld [vmem:[#allocation10 + $0x118] sm:$0xff] }
 0x31d   :  { %917 = vmatpush1.msra.mxu0 %v2275_v44  ;;  %881 = vmatprep.subr.mxu1 %v792_v43  ;;  %v791_v44 = vld [vmem:[#allocation10 + $0x110] sm:$0xff] }
 0x31e   :  { %918 = vmatprep.subr.mxu0 %v2278_v45  ;;  %882 = vmatpush2.msra.mxu1 %v791_v44  ;;  %v790_v45 = vld [vmem:[#allocation10 + $0x108] sm:$0xff] }
 0x31f   :  { %919 = vmatpush1.msra.mxu0 %v2281_v46  ;;  %v789_v46 = vld [vmem:[#allocation10 + $0x100] sm:$0xff]  ;;  %883 = vmatprep.subr.mxu1 %v790_v45 }
 0x320   :  { %920 = vmatprep.subr.mxu0 %v2284_v47  ;;  %884 = vmatpush2.msra.mxu1 %v789_v46  ;;  %v674_v47 = vld [vmem:[#allocation8] ss:$4 sm:$0x3] }
 0x321   :  { %921 = vmatpush1.msra.mxu0 %v2287_v48  ;;  %v683_v48 = vrot.slane %v674_v47, %v1780_v25 }
 0x322   :  { %922 = vmatprep.subr.mxu0 %v2290_v49  ;;  %v2882_v49 = vld [vmem:[#allocation20_spill] sm:$0xff] }
 0x323   :  { %923 = vmatpush1.msra.mxu0 %v2293_v50  ;;  %v679_v50 = vrot.slane %v674_v47, %v2882_v49  ;;  %v1071_v47 = vld [vmem:[%s2818_s9 + $0x170] sm:$0xff] }
 0x324   :  { %924 = vmatprep.subr.mxu0 %v2296_v51 }
 0x325   :  { %925 = vmatpush1.msra.mxu0 %v2299_v52 }
 0x326   :  { %926 = vmatprep.subr.mxu0 %v2302_v53 }
 0x327   :  { %927 = vmatpush1.msra.mxu0 %v2305_v54 }
 0x328   :  { %928 = vmatprep.subr.mxu0 %v2308_v55 }
 0x329   :  { %929 = vmatpush2.msra.mxu0 %v2311_v56 }
 0x32a   :  { %930 = vmatprep.subr.mxu0 %v2314_v57 }
 0x32b   :  { %931 = vmatpush2.msra.mxu0 %v2317_v58 }
 0x32c   :  { %932 = vmatprep.subr.mxu0 %v2320_v59 }
 0x32d   :  { %933 = vmatpush2.msra.mxu0 %v2323_v60 }
 0x32e   :  { %934 = vmatprep.subr.mxu0 %v2326_v61  ;;  %v1056_v61 = vld [vmem:[%s2818_s9 + $0xf8] sm:$0xff] }
 0x32f   :  { %935 = vmatpush2.msra.mxu0 %v2329_v62  ;;  %1101 = vmatprep.subr.mxu1 %v1056_v61  ;;  %v1055_v62 = vld [vmem:[%s2818_s9 + $0xf0] sm:$0xff]  ;;  %v1060_v61 = vld [vmem:[%s2818_s9 + $0x118] sm:$0xff] }
 0x330   :  { %936 = vmatprep.subr.mxu0 %v2864_v2  ;;  %v1031_v2 = vld [vmem:[%s2818_s9 + $0x30] sm:$0xff] }
 0x331   :  { %937 = vmatpush2.msra.mxu0 %v2865_v23  ;;  %v1030_v23 = vld [vmem:[%s2818_s9 + $0x28] sm:$0xff] }
 0x332   :  { %938 = vmatprep.subr.mxu0 %v2866_v24  ;;  %v1029_v24 = vld [vmem:[%s2818_s9 + $0x20] sm:$0xff] }
 0x333   :  { %939 = vmatpush2.msra.mxu0 %v2867_v26  ;;  %v1028_v26 = vld [vmem:[%s2818_s9 + $0x18] sm:$0xff] }
 0x334   :  { %940 = vmatprep.subr.mxu0 %v2868_v27  ;;  %v1027_v27 = vld [vmem:[%s2818_s9 + $0x10] sm:$0xff] }
 0x335   :  { %941 = vmatpush2.msra.mxu0 %v2869_v28  ;;  %v1026_v28 = vld [vmem:[%s2818_s9 + $0x8] sm:$0xff] }
 0x336   :  { %942 = vmatprep.subr.mxu0 %v2870_v29  ;;  %v1025_v29 = vld [vmem:[%s2818_s9] sm:$0xff] }
 0x337   :  { %943 = vmatpush2.msra.mxu0 %v2871_v30  ;;  %v1088_v30 = vld [vmem:[%s2818_s9 + $0x1f8] sm:$0xff] }
 0x338   :  { %944 = vmatprep.subr.mxu0 %v2872_v31  ;;  %v1087_v31 = vld [vmem:[%s2818_s9 + $0x1f0] sm:$0xff] }
 0x339   :  { %945 = vmatpush2.msra.mxu0 %v2873_v32  ;;  %v1086_v32 = vld [vmem:[%s2818_s9 + $0x1e8] sm:$0xff] }
 0x33a   :  { %946 = vmatprep.subr.mxu0 %v2874_v33  ;;  %v1085_v33 = vld [vmem:[%s2818_s9 + $0x1e0] sm:$0xff] }
 0x33b   :  { %947 = vmatpush2.msra.mxu0 %v2875_v34  ;;  %v1084_v34 = vld [vmem:[%s2818_s9 + $0x1d8] sm:$0xff] }
 0x33c   :  { %948 = vmatprep.subr.mxu0 %v2876_v35  ;;  %v1083_v35 = vld [vmem:[%s2818_s9 + $0x1d0] sm:$0xff] }
 0x33d   :  { %949 = vmatpush2.msra.mxu0 %v2877_v36  ;;  %v1082_v36 = vld [vmem:[%s2818_s9 + $0x1c8] sm:$0xff] }
 0x33e   :  { %950 = vmatprep.subr.mxu0 %v2878_v37  ;;  %v1081_v37 = vld [vmem:[%s2818_s9 + $0x1c0] sm:$0xff] }
 0x33f   :  { %951 = vmatpush2.msra.mxu0 %v2879_v38  ;;  %v1080_v38 = vld [vmem:[%s2818_s9 + $0x1b8] sm:$0xff] }
 0x340   :  { %952 = vmatprep.subr.mxu0 %v2880_v39  ;;  %v1079_v39 = vld [vmem:[%s2818_s9 + $0x1b0] sm:$0xff] }
 0x341   :  { %953 = vmatpush2.msra.mxu0 %v2881_v40  ;;  %v1078_v40 = vld [vmem:[%s2818_s9 + $0x1a8] sm:$0xff] }
 0x342   :  { %954 = vmatprep.subr.mxu0 %v794_v41  ;;  %v1077_v41 = vld [vmem:[%s2818_s9 + $0x1a0] sm:$0xff] }
 0x343   :  { %955 = vmatpush2.msra.mxu0 %v793_v42  ;;  %v1076_v42 = vld [vmem:[%s2818_s9 + $0x198] sm:$0xff] }
 0x344   :  { %956 = vmatprep.subr.mxu0 %v792_v43  ;;  %v1075_v43 = vld [vmem:[%s2818_s9 + $0x190] sm:$0xff] }
 0x345   :  { %957 = vmatpush2.msra.mxu0 %v791_v44  ;;  %v1074_v44 = vld [vmem:[%s2818_s9 + $0x188] sm:$0xff] }
 0x346   :  { %958 = vmatprep.subr.mxu0 %v790_v45  ;;  %v1073_v45 = vld [vmem:[%s2818_s9 + $0x180] sm:$0xff] }
 0x347   :  { %959 = vmatpush2.msra.mxu0 %v789_v46  ;;  %v1072_v46 = vld [vmem:[%s2818_s9 + $0x178] sm:$0xff] }
 0x3c8   :  { %v752_v51 = vpop.f32.mrf.mxu0 }
 0x3c9   :  { %v753_v54 = vadd.f32 %v752_v51, %v679_v50  ;;  %v1069_v50 = vld [vmem:[%s2818_s9 + $0x160] sm:$0xff]  ;;  %v1068_v51 = vld [vmem:[%s2818_s9 + $0x158] sm:$0xff] }
 0x3ca   :  { %v754_v52 = vpop.f32.mrf.mxu0 }
 0x3cb   :  { %v755_v53 = vadd.f32 %v754_v52, %v683_v48  ;;  %v1070_v48 = vld [vmem:[%s2818_s9 + $0x168] sm:$0xff]  ;;  %v1067_v52 = vld [vmem:[%s2818_s9 + $0x150] sm:$0xff] }
 0x3cd   :  { %885 = vmatprep.mubr.f32.mxu1 %v755_v53 }
 0x3ce   :  { %886 = vmatmul.mubr.f32.vlgmr.msra.gmra.mxu1 %v753_v54 }
 0x3cf   :  { %1102 = vmatpush1.msra.mxu1 %v1055_v62  ;;  %v1059_v62 = vld [vmem:[%s2818_s9 + $0x110] sm:$0xff] }
 0x3d0   :  { %1103 = vmatprep.subr.mxu1 %v1054_v63  ;;  %v1058_v63 = vld [vmem:[%s2818_s9 + $0x108] sm:$0xff] }
 0x3d1   :  { %1104 = vmatpush1.msra.mxu1 %v1053_v0  ;;  %v1057_v0 = vld [vmem:[%s2818_s9 + $0x100] sm:$0xff] }
 0x3d2   :  { %1105 = vmatprep.subr.mxu1 %v1052_v1  ;;  %v1203_v1 = vld [vmem:[#allocation11 + $0xf8] sm:$0xff] }
 0x3d3   :  { %1106 = vmatpush1.msra.mxu1 %v1051_v7  ;;  %v2659_v7 = vld [vmem:[#allocation11 + $0xf0] sm:$0xff]  ;;  %1215 = vmatprep.subr.mxu0 %v1203_v1 }
 0x3d4   :  { %1107 = vmatprep.subr.mxu1 %v1050_v8  ;;  %v2661_v8 = vld [vmem:[#allocation11 + $0xe8] sm:$0xff] }
 0x3d5   :  { %1108 = vmatpush1.msra.mxu1 %v1049_v22  ;;  %v2663_v22 = vld [vmem:[#allocation11 + $0xe0] sm:$0xff] }
 0x3d6   :  { %1109 = vmatprep.subr.mxu1 %v1048_v9  ;;  %v2666_v9 = vld [vmem:[#allocation11 + $0xd8] sm:$0xff] }
 0x3d7   :  { %1110 = vmatpush1.msra.mxu1 %v1047_v14  ;;  %v2669_v14 = vld [vmem:[#allocation11 + $0xd0] sm:$0xff] }
 0x3d8   :  { %1111 = vmatprep.subr.mxu1 %v1046_v16  ;;  %v2672_v16 = vld [vmem:[#allocation11 + $0xc8] sm:$0xff] }
 0x3d9   :  { %1112 = vmatpush1.msra.mxu1 %v1045_v10  ;;  %v2675_v10 = vld [vmem:[#allocation11 + $0xc0] sm:$0xff] }
 0x3da   :  { %1113 = vmatprep.subr.mxu1 %v1044_v15  ;;  %v2678_v15 = vld [vmem:[#allocation11 + $0xb8] sm:$0xff] }
 0x3db   :  { %1114 = vmatpush1.msra.mxu1 %v1043_v17  ;;  %v2681_v17 = vld [vmem:[#allocation11 + $0xb0] sm:$0xff] }
 0x3dc   :  { %1115 = vmatprep.subr.mxu1 %v1042_v12  ;;  %v2684_v12 = vld [vmem:[#allocation11 + $0xa8] sm:$0xff] }
 0x3dd   :  { %1116 = vmatpush1.msra.mxu1 %v1041_v18  ;;  %v2687_v18 = vld [vmem:[#allocation11 + $0xa0] sm:$0xff] }
 0x3de   :  { %1117 = vmatprep.subr.mxu1 %v1040_v19  ;;  %v2690_v19 = vld [vmem:[#allocation11 + $0x98] sm:$0xff] }
 0x3df   :  { %1118 = vmatpush1.msra.mxu1 %v1039_v13  ;;  %v2693_v13 = vld [vmem:[#allocation11 + $0x90] sm:$0xff] }
 0x3e0   :  { %1119 = vmatprep.subr.mxu1 %v1038_v11  ;;  %v2696_v11 = vld [vmem:[#allocation11 + $0x88] sm:$0xff] }
 0x3e1   :  { %1120 = vmatpush1.msra.mxu1 %v1037_v20  ;;  %v2699_v20 = vld [vmem:[#allocation11 + $0x80] sm:$0xff] }
 0x3e2   :  { %1121 = vmatprep.subr.mxu1 %v1036_v21  ;;  %v2702_v21 = vld [vmem:[#allocation11 + $0x78] sm:$0xff] }
 0x3e3   :  { %1122 = vmatpush1.msra.mxu1 %v1035_v4  ;;  %v2705_v4 = vld [vmem:[#allocation11 + $0x70] sm:$0xff] }
 0x3e4   :  { %1123 = vmatprep.subr.mxu1 %v1034_v3  ;;  %v2708_v3 = vld [vmem:[#allocation11 + $0x68] sm:$0xff] }
 0x3e5   :  { %1124 = vmatpush1.msra.mxu1 %v1033_v5  ;;  %v2711_v5 = vld [vmem:[#allocation11 + $0x60] sm:$0xff] }
 0x3e6   :  { %1125 = vmatprep.subr.mxu1 %v1032_v6  ;;  %v2714_v6 = vld [vmem:[#allocation11 + $0x58] sm:$0xff] }
 0x3e7   :  { %1126 = vmatpush1.msra.mxu1 %v1031_v2  ;;  %v2717_v2 = vld [vmem:[#allocation11 + $0x50] sm:$0xff] }
 0x3e8   :  { %1127 = vmatprep.subr.mxu1 %v1030_v23  ;;  %v2720_v23 = vld [vmem:[#allocation11 + $0x48] sm:$0xff] }
 0x3e9   :  { %1128 = vmatpush1.msra.mxu1 %v1029_v24  ;;  %v2723_v24 = vld [vmem:[#allocation11 + $0x40] sm:$0xff] }
 0x3ea   :  { %1129 = vmatprep.subr.mxu1 %v1028_v26  ;;  %v2726_v26 = vld [vmem:[#allocation11 + $0x38] sm:$0xff] }
 0x3eb   :  { %1130 = vmatpush1.msra.mxu1 %v1027_v27  ;;  %v2729_v27 = vld [vmem:[#allocation11 + $0x30] sm:$0xff] }
 0x3ec   :  { %1131 = vmatprep.subr.mxu1 %v1026_v28  ;;  %v2732_v28 = vld [vmem:[#allocation11 + $0x28] sm:$0xff] }
 0x3ed   :  { %1132 = vmatpush1.msra.mxu1 %v1025_v29  ;;  %v2735_v29 = vld [vmem:[#allocation11 + $0x20] sm:$0xff] }
 0x3ee   :  { %1133 = vmatprep.subr.mxu1 %v1088_v30  ;;  %v2738_v30 = vld [vmem:[#allocation11 + $0x18] sm:$0xff] }
 0x3ef   :  { %1134 = vmatpush2.msra.mxu1 %v1087_v31  ;;  %v2741_v31 = vld [vmem:[#allocation11 + $0x10] sm:$0xff] }
 0x3f0   :  { %1135 = vmatprep.subr.mxu1 %v1086_v32  ;;  %v2744_v32 = vld [vmem:[#allocation11 + $0x8] sm:$0xff] }
 0x3f1   :  { %1136 = vmatpush2.msra.mxu1 %v1085_v33  ;;  %v2747_v33 = vld [vmem:[#allocation11] sm:$0xff] }
 0x3f2   :  { %1137 = vmatprep.subr.mxu1 %v1084_v34  ;;  %v2750_v34 = vld [vmem:[#allocation11 + $0x138] sm:$0xff] }
 0x3f3   :  { %1138 = vmatpush2.msra.mxu1 %v1083_v35  ;;  %v2753_v35 = vld [vmem:[#allocation11 + $0x130] sm:$0xff] }
 0x3f4   :  { %1139 = vmatprep.subr.mxu1 %v1082_v36 }
 0x3f5   :  { %1140 = vmatpush2.msra.mxu1 %v1081_v37 }
 0x3f6   :  { %1141 = vmatprep.subr.mxu1 %v1080_v38 }
 0x3f7   :  { %1142 = vmatpush2.msra.mxu1 %v1079_v39 }
 0x3f8   :  { %1143 = vmatprep.subr.mxu1 %v1078_v40  ;;  %v972_v40 = vld [vmem:[#allocation8 + $0x1] ss:$4 sm:$0x3] }
 0x3f9   :  { %1144 = vmatpush2.msra.mxu1 %v1077_v41  ;;  %v987_v41 = vld [vmem:[#allocation8 + $0x2] ss:$4 sm:$0x3] }
 0x3fa   :  { %1145 = vmatprep.subr.mxu1 %v1076_v42  ;;  %v977_v42 = vrot.slane %v972_v40, %v2882_v49 }
 0x3fb   :  { %1146 = vmatpush2.msra.mxu1 %v1075_v43 }
 0x3fc   :  { %1147 = vmatprep.subr.mxu1 %v1074_v44 }
 0x3fd   :  { %1148 = vmatpush2.msra.mxu1 %v1073_v45  ;;  %v981_v45 = vrot.slane %v972_v40, %v1780_v25 }
 0x3fe   :  { %1149 = vmatprep.subr.mxu1 %v1072_v46  ;;  %v992_v46 = vrot.slane %v987_v41, %v2882_v49 }
 0x3ff   :  { %1150 = vmatpush2.msra.mxu1 %v1071_v47 }
 0x400   :  { %1151 = vmatprep.subr.mxu1 %v1070_v48 }
 0x401   :  { %1152 = vmatpush2.msra.mxu1 %v1069_v50  ;;  %v996_v50 = vrot.slane %v987_v41, %v1780_v25 }
 0x402   :  { %1153 = vmatprep.subr.mxu1 %v1068_v51 }
 0x403   :  { %1154 = vmatpush2.msra.mxu1 %v1067_v52 }
 0x48e   :  { %v887_v55 = vpop.f32.mrf.mxu1 }
 0x48f   :  { %v2459_v56 = vsub.f32 %v753_v54, %v887_v55  ;;  %v1065_v54 = vld [vmem:[%s2818_s9 + $0x140] sm:$0xff]  ;;  %v1064_v55 = vld [vmem:[%s2818_s9 + $0x138] sm:$0xff] }
 0x490   :  { %v889_v57 = vpop.f32.mrf.mxu1 }
 0x491   :  { %v2461_v58 = vsub.f32 %v755_v53, %v889_v57  ;;  %v894_v60 = vmul.f32 %v2459_v56, %v2459_v56  ;;  %v1066_v53 = vld [vmem:[%s2818_s9 + $0x148] sm:$0xff]  ;;  %v1063_v57 = vld [vmem:[%s2818_s9 + $0x130] sm:$0xff] }
 0x492   :  { %1155 = vmatprep.subr.mxu1 %v1066_v53 }
 0x493   :  { %v895_v59 = vmul.f32 %v2461_v58, %v2461_v58  ;;  %1156 = vmatpush2.msra.mxu1 %v1065_v54 }
 0x494   :  { %1157 = vmatprep.subr.mxu1 %v1064_v55 }
 0x495   :  { %960 = vmatprep.mubr.f32.mxu0 %v895_v59  ;;  %v1062_v59 = vld [vmem:[%s2818_s9 + $0x128] sm:$0xff]  ;;  %1158 = vmatpush2.msra.mxu1 %v1063_v57 }
 0x496   :  { %961 = vmatmul.mubr.f32.vlgmr.msra.gmra.mxu0 %v894_v60  ;;  %v1061_v60 = vld [vmem:[%s2818_s9 + $0x120] sm:$0xff]  ;;  %1159 = vmatprep.subr.mxu1 %v1062_v59 }
 0x497   :  { %1160 = vmatpush2.msra.mxu1 %v1061_v60  ;;  %1216 = vmatpush1.msra.mxu0 %v2659_v7 }
 0x498   :  { %1161 = vmatprep.subr.mxu1 %v1060_v61  ;;  %1217 = vmatprep.subr.mxu0 %v2661_v8 }
 0x499   :  { %1162 = vmatpush2.msra.mxu1 %v1059_v62  ;;  %1218 = vmatpush1.msra.mxu0 %v2663_v22 }
 0x49a   :  { %1163 = vmatprep.subr.mxu1 %v1058_v63  ;;  %1219 = vmatprep.subr.mxu0 %v2666_v9 }
 0x49b   :  { %1164 = vmatpush2.msra.mxu1 %v1057_v0  ;;  %1220 = vmatpush1.msra.mxu0 %v2669_v14 }
 0x49c   :  { %1301 = vmatprep.subr.mxu1 %v1203_v1  ;;  %1221 = vmatprep.subr.mxu0 %v2672_v16 }
 0x49d   :  { %1222 = vmatpush1.msra.mxu0 %v2675_v10 }
 0x49e   :  { %1223 = vmatprep.subr.mxu0 %v2678_v15 }
 0x49f   :  { %1224 = vmatpush1.msra.mxu0 %v2681_v17 }
 0x4a0   :  { %1225 = vmatprep.subr.mxu0 %v2684_v12 }
 0x4a1   :  { %1226 = vmatpush1.msra.mxu0 %v2687_v18 }
 0x4a2   :  { %1227 = vmatprep.subr.mxu0 %v2690_v19 }
 0x4a3   :  { %1228 = vmatpush1.msra.mxu0 %v2693_v13 }
 0x4a4   :  { %1229 = vmatprep.subr.mxu0 %v2696_v11 }
 0x4a5   :  { %1230 = vmatpush1.msra.mxu0 %v2699_v20 }
 0x4a6   :  { %1231 = vmatprep.subr.mxu0 %v2702_v21 }
 0x4a7   :  { %1232 = vmatpush1.msra.mxu0 %v2705_v4 }
 0x4a8   :  { %1233 = vmatprep.subr.mxu0 %v2708_v3 }
 0x4a9   :  { %1234 = vmatpush1.msra.mxu0 %v2711_v5 }
 0x4aa   :  { %1235 = vmatprep.subr.mxu0 %v2714_v6 }
 0x4ab   :  { %1236 = vmatpush1.msra.mxu0 %v2717_v2 }
 0x4ac   :  { %1237 = vmatprep.subr.mxu0 %v2720_v23 }
 0x4ad   :  { %1238 = vmatpush1.msra.mxu0 %v2723_v24 }
 0x4ae   :  { %1239 = vmatprep.subr.mxu0 %v2726_v26 }
 0x4af   :  { %1240 = vmatpush1.msra.mxu0 %v2729_v27 }
 0x4b0   :  { %1241 = vmatprep.subr.mxu0 %v2732_v28 }
 0x4b1   :  { %1242 = vmatpush1.msra.mxu0 %v2735_v29 }
 0x4b2   :  { %1243 = vmatprep.subr.mxu0 %v2738_v30 }
 0x4b3   :  { %1244 = vmatpush1.msra.mxu0 %v2741_v31 }
 0x4b4   :  { %1245 = vmatprep.subr.mxu0 %v2744_v32 }
 0x4b5   :  { %1246 = vmatpush1.msra.mxu0 %v2747_v33 }
 0x4b6   :  { %1271 = vmatprep.subr.mxu0 %v2750_v34 }
 0x4b7   :  { %1272 = vmatpush2.msra.mxu0 %v2753_v35 }
 0x556   :  { %v962_v36 = vpop.f32.mrf.mxu0 }
 0x557   :  { %v963_v37 = vadd.f32 1e-05, %v962_v36 }
 0x558   :  { %v964_v38 = vpop.f32.mrf.mxu0 }
 0x559   :  { %1452 = vrsqrt.f32 %v963_v37  ;;  %v965_v39 = vadd.f32 1e-05, %v964_v38 }
 0x55b   :  { %1454 = vrsqrt.f32 %v965_v39 }
 0x566   :  { %v1453_v43 = vpop.eup %1452 }
 0x567   :  { %v969_v44 = vmul.f32 %v1453_v43, %v2459_v56 }
 0x568   :  { %v1455_v47 = vpop.eup %1454 }
 0x569   :  { %v970_v48 = vmul.f32 %v1455_v47, %v2461_v58  ;;  %v984_v51 = vmul.f32 %v977_v42, %v969_v44 }
 0x56b   :  { %v985_v52 = vmul.f32 %v981_v45, %v970_v48  ;;  %v999_v53 = vadd.f32 %v992_v46, %v984_v51  ;;  %v2884_v51 = vlaneseq }
 0x56d   :  { %v1000_v54 = vadd.f32 %v996_v50, %v985_v52  ;;  %v1001_v55 = vmin.f32 %v999_v53, 20.0  ;;  %vm1019_vm3 = vcmp.gt.f32.partialorder %v999_v53, 20.0  ;;  %vm1396_vm5 = vcmp.lt.s32.totalorder %v2884_v51, 160 }
 0x56f   :  { %v1002_v57 = vmin.f32 %v1000_v54, 20.0  ;;  %v1003_v59 = vmul.f32 1.442695, %v1001_v55  ;;  %vm1020_vm4 = vcmp.gt.f32.partialorder %v1000_v54, 20.0 }
 0x571   :  { %v1005_v60 = vmul.f32 1.442695, %v1002_v57  ;;  %1456 = vpow2.f32 %v1003_v59 }
 0x573   :  { %1458 = vpow2.f32 %v1005_v60 }
 0x57e   :  { %v1457_v56 = vpop.eup %1456 }
 0x57f   :  { %v1007_v61 = vadd.f32 1.0, %v1457_v56 }
 0x580   :  { %v1459_v62 = vpop.eup %1458 }
 0x581   :  { %v1008_v63 = vadd.f32 1.0, %v1459_v62  ;;  %v1009_v0 = vmul.f32 %v1007_v61, %v1007_v61 }
 0x583   :  { %v1010_v1 = vmul.f32 %v1008_v63, %v1008_v63  ;;  %v1013_v36 = vadd.f32 1.0, %v1009_v0  ;;  %v1423_v37 = vadd.f32 -1.0, %v1009_v0 }
 0x585   :  { %v1014_v58 = vadd.f32 1.0, %v1010_v1  ;;  %1460 = vrcp.f32 %v1013_v36  ;;  %v1424_v39 = vadd.f32 -1.0, %v1010_v1 }
 0x587   :  { %1462 = vrcp.f32 %v1014_v58 }
 0x592   :  { %v1461_v38 = vpop.eup %1460 }
 0x593   :  { %v1016_v40 = vmul.f32 %v1461_v38, %v1423_v37 }
 0x594   :  { %v1463_v41 = vpop.eup %1462 }
 0x595   :  { %v1018_v42 = vmul.f32 %v1463_v41, %v1424_v39  ;;  %v1021_v43 = vsel %vm1019_vm3, 1.0, %v1016_v40 }
 0x596   :  { %v1023_v46 = vmul.f32 %v1021_v43, %v999_v53 }
 0x597   :  { %v1022_v44 = vsel %vm1020_vm4, 1.0, %v1018_v42 }
 0x598   :  { %v1024_v45 = vmul.f32 %v1022_v44, %v1000_v54 }
 0x59a   :  { %1165 = vmatprep.mubr.f32.mxu1 %v1024_v45 }
 0x59b   :  { %1166 = vmatmul.mubr.f32.vlgmr.msra.gmra.mxu1 %v1023_v46 }
 0x59c   :  { %1302 = vmatpush1.msra.mxu1 %v2659_v7  ;;  %v1209_v7 = vld [vmem:[#allocation11 + $0x128] sm:$0xff] }
 0x59d   :  { %1303 = vmatprep.subr.mxu1 %v2661_v8  ;;  %1273 = vmatprep.subr.mxu0 %v1209_v7  ;;  %v1208_v8 = vld [vmem:[#allocation11 + $0x120] sm:$0xff] }
 0x59e   :  { %1304 = vmatpush1.msra.mxu1 %v2663_v22  ;;  %1274 = vmatpush2.msra.mxu0 %v1208_v8  ;;  %v1207_v22 = vld [vmem:[#allocation11 + $0x118] sm:$0xff] }
 0x59f   :  { %1305 = vmatprep.subr.mxu1 %v2666_v9  ;;  %1275 = vmatprep.subr.mxu0 %v1207_v22  ;;  %v1206_v9 = vld [vmem:[#allocation11 + $0x110] sm:$0xff] }
 0x5a0   :  { %1306 = vmatpush1.msra.mxu1 %v2669_v14  ;;  %1276 = vmatpush2.msra.mxu0 %v1206_v9  ;;  %v1205_v14 = vld [vmem:[#allocation11 + $0x108] sm:$0xff] }
 0x5a1   :  { %1307 = vmatprep.subr.mxu1 %v2672_v16  ;;  %v1204_v16 = vld [vmem:[#allocation11 + $0x100] sm:$0xff]  ;;  %1277 = vmatprep.subr.mxu0 %v1205_v14 }
 0x5a2   :  { %1308 = vmatpush1.msra.mxu1 %v2675_v10  ;;  %1278 = vmatpush2.msra.mxu0 %v1204_v16  ;;  %v1089_v10 = vld [vmem:[%s2819_s10] sm:$0x3]  ;;  %s1632_s10 = smov [#allocation13]  }
 0x5a3   :  { %1309 = vmatprep.subr.mxu1 %v2678_v15  ;;  %v1098_v15 = vrot.slane %v1089_v10, %v1780_v25  ;;  %s1405_s16 = sshll.u32 %s1632_s10, 4  ;;  %s1406_s16 = int_to_ptr.vmem [resolvable:$true] %s1405_s16 }
 0x5a4   :  { %1310 = vmatpush1.msra.mxu1 %v2681_v17  ;;  %v1094_v17 = vrot.slane %v1089_v10, %v2882_v49  ;;  %s1592_s17 = scalar_lea.vmem %s1406_s16, 32  ;;  %p1597_p3 = scmp.lt.s32.totalorder %s1406_s16, %s1406_s16 }
 0x5a5   :  { %1311 = vmatprep.subr.mxu1 %v2684_v12  ;;  %p1593_p2 = scmp.ne.s32.totalorder %s1406_s16, %s1592_s17  ;;  %p1598_p4 = scmp.lt.s32.totalorder %s1592_s17, %s1592_s17 }
 0x5a6   :  { %1312 = vmatpush1.msra.mxu1 %v2687_v18 }
 0x5a7   :  { %1313 = vmatprep.subr.mxu1 %v2690_v19  ;;  %p1599_p5 = por %p1598_p4, %p1597_p3 }
 0x5a8   :  { %1314 = vmatpush1.msra.mxu1 %v2693_v13 }
 0x5a9   :  { %1315 = vmatprep.subr.mxu1 %v2696_v11  ;;  %p1600_p6 = pnand %p1599_p5, %p1593_p2 }
 0x5aa   :  { %1316 = vmatpush1.msra.mxu1 %v2699_v20 }
 0x5ab   :  { %1317 = vmatprep.subr.mxu1 %v2702_v21 }
 0x5ac   :  { %1318 = vmatpush1.msra.mxu1 %v2705_v4 }
 0x5ad   :  { %1319 = vmatprep.subr.mxu1 %v2708_v3 }
 0x5ae   :  { %1320 = vmatpush1.msra.mxu1 %v2711_v5 }
 0x5af   :  { %1321 = vmatprep.subr.mxu1 %v2714_v6 }
 0x5b0   :  { %1322 = vmatpush1.msra.mxu1 %v2717_v2 }
 0x5b1   :  { %1323 = vmatprep.subr.mxu1 %v2720_v23 }
 0x5b2   :  { %1324 = vmatpush1.msra.mxu1 %v2723_v24 }
 0x5b3   :  { %1325 = vmatprep.subr.mxu1 %v2726_v26 }
 0x5b4   :  { %1326 = vmatpush1.msra.mxu1 %v2729_v27 }
 0x5b5   :  { %1327 = vmatprep.subr.mxu1 %v2732_v28  ;;  %v1631_v28 = vmov 1966171168  }
 0x5b6   :  { %1328 = vmatpush1.msra.mxu1 %v2735_v29  ;;  %v1380_v29 = vunpack.c.l.s4 %v1631_v28 }
 0x5b7   :  { %1329 = vmatprep.subr.mxu1 %v2738_v30 }
 0x5b8   :  { %1330 = vmatpush1.msra.mxu1 %v2741_v31  ;;  %v1381_v30 = vunpack.c.0.s8 %v1380_v29 }
 0x5b9   :  { %1331 = vmatprep.subr.mxu1 %v2744_v32 }
 0x5ba   :  { %1332 = vmatpush1.msra.mxu1 %v2747_v33 }
 0x5bb   :  { %1357 = vmatprep.subr.mxu1 %v2750_v34 }
 0x5bc   :  { %1358 = vmatpush2.msra.mxu1 %v2753_v35  ;;  %v2883_v35 = vld [vmem:[#allocation19_spill] sm:$0xff] }
 0x5bd   :  { %1359 = vmatprep.subr.mxu1 %v1209_v7  ;;  %v1384_v47 = vsub.s32 %v1381_v30, %v2883_v35 }
 0x5be   :  { %1360 = vmatpush2.msra.mxu1 %v1208_v8 }
 0x5bf   :  { %1361 = vmatprep.subr.mxu1 %v1207_v22 }
 0x5c0   :  { %1362 = vmatpush2.msra.mxu1 %v1206_v9 }
 0x5c1   :  { %1363 = vmatprep.subr.mxu1 %v1205_v14 }
 0x5c2   :  { %1364 = vmatpush2.msra.mxu1 %v1204_v16 }
 0x65b   :  { %v1167_v12 = vpop.f32.mrf.mxu1 }
 0x65c   :  { %v1168_v13 = vadd.f32 %v1167_v12, %v1094_v17 }
 0x65d   :  { %v1169_v18 = vpop.f32.mrf.mxu1 }
 0x65e   :  { %v1170_v19 = vadd.f32 %v1169_v18, %v1098_v15 }
 0x660   :  { %1425 = vmatprep.mubr.msk.f32.mxu0 %vm170_vm0, %v1170_v19 }
 0x661   :  { %1280 = vmatmul.mubr.f32.vlgmr.msra.gmra.mxu0 %v1168_v13 }
 0x721   :  { %v1281_v11 = vpop.f32.mrf.mxu0 }
 0x722   :  { %v1286_v20 = vmul.f32 0.1, %v1281_v11 }
 0x723   :  { %v1283_v21 = vpop.f32.mrf.mxu0 }
 0x724   :  { %v1288_v4 = vsub.f32 %v1168_v13, %v1286_v20  ;;  %v1287_v3 = vmul.f32 0.1, %v1283_v21 }
 0x726   :  { %v1426_v5 = vclamps-f32 %v1288_v4, 80.0  ;;  %v1289_v6 = vsub.f32 %v1170_v19, %v1287_v3 }
 0x728   :  { %v1427_v2 = vclamps-f32 %v1289_v6, 80.0  ;;  %v1294_v23 = vmul.f32 1.442695, %v1426_v5 }
 0x72a   :  { %v1296_v24 = vmul.f32 1.442695, %v1427_v2 }
 0x72c   :  { %1464 = vpow2.f32 %v1296_v24 }
 0x72d   :  { %1466 = vpow2.f32 %v1294_v23 }
 0x739   :  { %v1465_v25 = vpop.eup %1464 }
 0x73a   :  { %v1467_v49 = vpop.eup %1466  ;;  %1428 = vmatprep.mubr.msk.f32.mxu1 %vm170_vm0, %v1465_v25 }
 0x73b   :  { %1366 = vmatmul.mubr.f32.vlgmr.msra.gmra.mxu1 %v1467_v49 }
 0x7fb   :  { %v1367_v26 = vpop.f32.mrf.mxu1 }
 0x7fc   :  { %1468 = vrcp.f32 %v1367_v26 }
 0x7fd   :  { %v1369_v27 = vpop.f32.mrf.mxu1 }
 0x7fe   :  { %1470 = vrcp.f32 %v1369_v27 }
 0x809   :  { %v1469_v31 = vpop.eup %1468 }
 0x80a   :  { %v1374_v33 = vmul.f32 %v1469_v31, %v1467_v49 }
 0x80b   :  { %v1471_v32 = vpop.eup %1470 }
 0x80c   :  { %v1375_v34 = vmul.f32 %v1471_v32, %v1465_v25 }
 0x80e   :  { %v1378_v48 = vcombine.low %v1374_v33, %v1375_v34 }
 0x810   :  { %v1385_v50 = vrot.slane %v1378_v48, %v1384_v47 }
 0x812   :  { %v1392_v52 = vrot.slane %v1385_v50, %v1384_v47 }
 0x814   :  { %1398 = vst.msk [vmem:[#allocation13] sm:$0x3] %vm1396_vm5, %v1392_v52 }
 0x815   :  { %1603 = shalt.err (!%p1600_p6)
}
 0x816   :  { %1408 = dma.vmem_to_hbm [thread:$0]  %s1406_s16, 32, %s2821_s12, [#allocation4]  }
 0x817   :  { %1620 = dma.done.wait [#allocation4], 32  }
 0x818   :  { %1621 = vsyncadd [#allocation4], 4294967264 }
 0x819   :  { %1412 = vsyncpa [#allocation3], 1 }
 0x81a   :  { %1413 = vsyncpa [#allocation6], 1 }
 0x81b   :  { %1414 = vsyncpa [#allocation9], 1 }
 0x81c   :  { %1415 = vsyncpa [#allocation12], 1 }
 0x81d   :  { %1416 = vsyncpa [#allocation4], 1 }

</bundles_post_ra>
